<compile_context>
chip_gen: v7x
topology: tpu7x:2x2x1
jax: 0.10.0
libtpu: 0.0.40
codegen_flags: <defaults>
</compile_context>

<pallas_src>
import jax
import jax.numpy as jnp
import numpy as np
from jax.experimental import pallas as pl
from jax.experimental.pallas import tpu as pltpu


def _round_up(n, m):
    return ((n + m - 1) // m) * m


# ---------------------------------------------------------------------------
# Fused Pallas kernel
# ---------------------------------------------------------------------------
def _build_fused_kernel(T, Bp, H, L):
    """Kernel closure over static sizes: T timesteps, padded batch Bp, hidden H, L layers.

    Ref layout (inputs, output, scratch):
      x        : (T*Bp, I)  bf16   time-major rows (row t*Bp + b), batch zero-padded
      w_emb    : (I, H)     bf16,  b_emb : (1, H) f32
      per layer l (3 refs):
        wih_cat : (Din_l, 8H) bf16  gate cols interleaved per gate
                                    [i_f i_b | f_f f_b | g_f g_b | o_f o_b]
        whh_cat : (2H, 8H)    bf16  block-diagonal: rows 0:H (h_fwd) feed fwd gate
                                    cols, rows H:2H (h_bwd) feed bwd gate cols
        b_cat   : (1, 8H)     f32   (b_ih + b_hh), same interleaved column order
      w_fc     : (2H, OFp)  bf16,  b_fc : (1, OFp) f32   (OFp = O*F padded to 128)
      out      : (Bp, OFp)  f32
      y_scr    : (T*Bp, 2H) f32    scratch: per-layer outputs [y_fwd | y_bwd]
    """
    H2, H8 = 2 * H, 8 * H
    BF, F32 = jnp.bfloat16, jnp.float32

    def kernel(*refs):
        x_ref, wemb_ref, bemb_ref = refs[0], refs[1], refs[2]
        layer_refs = refs[3:3 + 3 * L]
        wfc_ref = refs[3 + 3 * L]
        bfc_ref = refs[4 + 3 * L]
        out_ref = refs[5 + 3 * L]
        y_ref = refs[6 + 3 * L]          # VMEM scratch (T*Bp, 2H) f32

        # Hoisted per-lane constants for the fused (Bp, 8H) gate tile.
        lane8 = jax.lax.broadcasted_iota(jnp.int32, (Bp, H8), 1)
        is_g = (lane8 >= 2 * H2) & (lane8 < 3 * H2)          # 'g' (tanh) gate block
        # sigmoid(x) = 0.5 * tanh(0.5 * x) + 0.5 -> single tanh pass over all lanes.
        gscale = jnp.where(is_g, 1.0, 0.5).astype(F32)
        gbias = jnp.where(is_g, 0.0, 0.5).astype(F32)
        is_fwd = (lane8 % H2) < H                             # fwd lanes of each gate
        first_half = jax.lax.broadcasted_iota(jnp.int32, (Bp, H2), 1) < H

        # ---- embedding: (T*Bp, I) @ (I, H) + b -> time-major activations ----
        xin = jnp.dot(x_ref[...], wemb_ref[...],
                      preferred_element_type=F32) + bemb_ref[...]

        zero = jnp.zeros((Bp, H2), F32)
        last = None

        for l in range(L):
            wih_ref = layer_refs[3 * l + 0]
            whh_ref = layer_refs[3 * l + 1]
            b_ref = layer_refs[3 * l + 2]
            last_layer = (l == L - 1)

            # Hoisted input projection, both directions, all timesteps:
            # (T*Bp, Din) @ (Din, 8H) + bias.
            src = xin.astype(BF) if l == 0 else y_ref[...].astype(BF)
            gx = jnp.dot(src, wih_ref[...], preferred_element_type=F32) + b_ref[...]

            whh = whh_ref[...]                                # hoisted (2H, 8H) bf16
            h = zero                                          # [h_fwd | h_bwd]
            c = zero                                          # [c_fwd | c_bwd]
            h_s0 = None

            # Time loop fully unrolled (T static, small). At step s the fwd direction
            # processes t=s and the bwd direction t=T-1-s, stacked in one gate tile.
            # TODO(synk): for large T switch to lax.fori_loop(unroll=k) with pl.ds
            #             slices to keep live ranges bounded.
            for s in range(T):
                tf, tb = s, T - 1 - s
                gates = jnp.where(is_fwd,
                                  gx[tf * Bp:(tf + 1) * Bp, :],
                                  gx[tb * Bp:(tb + 1) * Bp, :])
                if s > 0:                                     # h0 == 0 at s == 0
                    gates = gates + jnp.dot(h.astype(BF), whh,
                                            preferred_element_type=F32)
                act = jnp.tanh(gates * gscale) * gscale + gbias
                c = act[:, H2:2 * H2] * c + act[:, 0:H2] * act[:, 2 * H2:3 * H2]
                h = act[:, 3 * H2:4 * H2] * jnp.tanh(c)       # [h_fwd(tf) | h_bwd(tb)]

                if last_layer:
                    if s == 0:
                        h_s0 = h             # its bwd half is h_bwd at t = T-1
                else:
                    y_ref[tf * Bp:(tf + 1) * Bp, 0:H] = h[:, 0:H]
                    y_ref[tb * Bp:(tb + 1) * Bp, H:H2] = h[:, H:H2]
                # inter-layer dropout: identity in eval mode.

            if last_layer:
                # out[:, -1, :] = [h_fwd(T-1) | h_bwd(T-1)]
                last = jnp.where(first_half, h, h_s0)

        # ---- Dropout (identity in eval) -> fc (lane-dense, padded columns) ----
        out_ref[...] = jnp.dot(last.astype(BF), wfc_ref[...],
                               preferred_element_type=F32) + bfc_ref[...]

    return kernel


# ---------------------------------------------------------------------------
# Parameters (deterministic, PyTorch-shaped)
# ---------------------------------------------------------------------------
def init_params(key, input_size, output_size, forecast_steps, hidden_size, num_layers):
    H = hidden_size
    keys = jax.random.split(key, 4 + 8 * num_layers)

    def w(k, shape, fan_in):
        bound = 1.0 / np.sqrt(fan_in)
        return jax.random.uniform(k, shape, jnp.float32, -bound, bound)

    params = {
        "emb_w": w(keys[0], (H, input_size), input_size),          # nn.Linear(I, H)
        "emb_b": w(keys[1], (H,), input_size),
        "fc_w": w(keys[2], (output_size * forecast_steps, 2 * H), 2 * H),
        "fc_b": w(keys[3], (output_size * forecast_steps,), 2 * H),
        "lstm": [],
    }
    ki = 4
    for l in range(num_layers):
        in_l = H if l == 0 else 2 * H
        layer = {}
        for suffix in ("fwd", "bwd"):
            layer[suffix] = dict(
                w_ih=w(keys[ki + 0], (4 * H, in_l), H),
                w_hh=w(keys[ki + 1], (4 * H, H), H),
                b_ih=w(keys[ki + 2], (4 * H,), H),
                b_hh=w(keys[ki + 3], (4 * H,), H),
            )
            ki += 4
        params["lstm"].append(layer)
    return params


def prepare_kernel_params(params, hidden_size, num_layers):
    """One-time host-side re-layout + bf16 cast of the PyTorch-shaped weights."""
    H = hidden_size
    BF = jnp.bfloat16
    OF = params["fc_b"].shape[0]
    OFp = _round_up(OF, 128)

    def interleave_cols(wf_t, wb_t):
        # (Din, 4H) x 2 with cols [i|f|g|o] -> (Din, 8H) cols
        # [i_f i_b | f_f f_b | g_f g_b | o_f o_b]
        blocks = []
        for g in range(4):
            blocks.append(wf_t[:, g * H:(g + 1) * H])
            blocks.append(wb_t[:, g * H:(g + 1) * H])
        return jnp.concatenate(blocks, axis=1)

    prep = {
        "wemb_t": params["emb_w"].T.astype(BF),                          # (I, H)
        "bemb": params["emb_b"].reshape(1, H).astype(jnp.float32),
        "wfc_t": jnp.zeros((2 * H, OFp), BF).at[:, :OF].set(
            params["fc_w"].T.astype(BF)),                                # (2H, OFp)
        "bfc": jnp.zeros((1, OFp), jnp.float32).at[:, :OF].set(
            params["fc_b"].reshape(1, OF)),
        "ofp": OFp,
        "layers": [],
    }
    zH = jnp.zeros((H, H), jnp.float32)
    for l in range(num_layers):
        lf = params["lstm"][l]["fwd"]
        lb = params["lstm"][l]["bwd"]
        wih_cat = interleave_cols(lf["w_ih"].T, lb["w_ih"].T).astype(BF)   # (Din, 8H)
        # Block-diagonal recurrent weights: [h_fwd | h_bwd] (2H) -> all 8H gate cols.
        whhf_t, whhb_t = lf["w_hh"].T, lb["w_hh"].T                        # (H, 4H)
        top = jnp.concatenate(
            [m for g in range(4) for m in (whhf_t[:, g * H:(g + 1) * H], zH)], axis=1)
        bot = jnp.concatenate(
            [m for g in range(4) for m in (zH, whhb_t[:, g * H:(g + 1) * H])], axis=1)
        whh_cat = jnp.concatenate([top, bot], axis=0).astype(BF)           # (2H, 8H)
        bf = (lf["b_ih"] + lf["b_hh"]).reshape(1, 4 * H)
        bb = (lb["b_ih"] + lb["b_hh"]).reshape(1, 4 * H)
        b_cat = interleave_cols(bf, bb).astype(jnp.float32)                # (1, 8H)
        prep["layers"].append(dict(wih_cat=wih_cat, whh_cat=whh_cat, b_cat=b_cat))
    return prep


# ---------------------------------------------------------------------------
# Model forward: single fused pallas_call
# ---------------------------------------------------------------------------
def lstm_model_forward(prep, x, _unused, forecast_steps, output_size,
                       hidden_size, num_layers):
    # x: (B, T, input_size) float32, batch_first like the PyTorch module.
    B, T, I = x.shape
    H = hidden_size
    OF = output_size * forecast_steps
    OFp = prep["ofp"]
    Bp = _round_up(B, 8)   # f32 sublane tile -> per-step row slices stay aligned

    # Single small layout op: batch-first -> time-major, batch zero-padded, bf16.
    x_tm = jnp.transpose(x, (1, 0, 2))                                   # (T, B, I)
    if Bp != B:
        x_tm = jnp.pad(x_tm, ((0, 0), (0, Bp - B), (0, 0)))
    x_tm = x_tm.reshape(T * Bp, I).astype(jnp.bfloat16)

    args = [x_tm, prep["wemb_t"], prep["bemb"]]
    for l in range(num_layers):
        lyr = prep["layers"][l]
        args += [lyr["wih_cat"], lyr["whh_cat"], lyr["b_cat"]]
    args += [prep["wfc_t"], prep["bfc"]]

    kernel = _build_fused_kernel(T, Bp, H, num_layers)
    out = pl.pallas_call(
        kernel,
        out_shape=jax.ShapeDtypeStruct((Bp, OFp), jnp.float32),
        in_specs=[pl.BlockSpec(memory_space=pltpu.MemorySpace.VMEM) for _ in args],
        out_specs=pl.BlockSpec(memory_space=pltpu.MemorySpace.VMEM),
        scratch_shapes=[pltpu.VMEM((T * Bp, 2 * H), jnp.float32)],
    )(*args)
    return out[:B, :OF].reshape(-1, forecast_steps, output_size)


# ---------------------------------------------------------------------------
# Pure-JAX reference (mirrors torch semantics) for a correctness check
# ---------------------------------------------------------------------------
def _cell_ref(x_t, h, c, p, H):
    gates = x_t @ p["w_ih"].T + p["b_ih"] + h @ p["w_hh"].T + p["b_hh"]
    i = jax.nn.sigmoid(gates[:, :H])
    f = jax.nn.sigmoid(gates[:, H:2 * H])
    g = jnp.tanh(gates[:, 2 * H:3 * H])
    o = jax.nn.sigmoid(gates[:, 3 * H:])
    c = f * c + i * g
    h = o * jnp.tanh(c)
    return h, c


def reference_forward(params, x, forecast_steps, output_size, H, num_layers):
    B, T, _ = x.shape
    layer_in = x @ params["emb_w"].T + params["emb_b"]
    for l in range(num_layers):
        dir_outs = []
        for suffix, reverse in (("fwd", False), ("bwd", True)):
            p = params["lstm"][l][suffix]
            h = jnp.zeros((B, H), jnp.float32)
            c = jnp.zeros((B, H), jnp.float32)
            ys = []
            ts = range(T - 1, -1, -1) if reverse else range(T)
            for t in ts:
                h, c = _cell_ref(layer_in[:, t, :], h, c, p, H)
                ys.append(h)
            if reverse:
                ys = ys[::-1]
            dir_outs.append(jnp.stack(ys, axis=1))
        layer_in = jnp.concatenate(dir_outs, axis=-1)
    last = layer_in[:, -1, :]
    out = last @ params["fc_w"].T + params["fc_b"]
    return out.reshape(-1, forecast_steps, output_size)


if __name__ == "__main__":
    input_size, output_size, forecast_steps = 16, 4, 3
    hidden_size, num_layers = 32, 2
    B, T = 2, 8

    key = jax.random.PRNGKey(0)
    k_param, k_x = jax.random.split(key)
    params = init_params(k_param, input_size, output_size, forecast_steps,
                         hidden_size, num_layers)
    prep = prepare_kernel_params(params, hidden_size, num_layers)
    x = jax.random.normal(k_x, (B, T, input_size), jnp.float32)

    out = lstm_model_forward(prep, x, None, forecast_steps, output_size,
                             hidden_size, num_layers)
    out = jax.block_until_ready(out)
    assert out.shape == (B, forecast_steps, output_size), out.shape

    ref = reference_forward(params, x, forecast_steps, output_size,
                            hidden_size, num_layers)
    # Tolerance: kernel uses bf16 MXU operands (f32 accumulation / f32 state);
    # bf16 quantization compounds mildly over T*L recurrent steps.  Structural
    # errors would be orders of magnitude larger than 3e-2.
    np.testing.assert_allclose(np.asarray(out), np.asarray(ref),
                               atol=3e-2, rtol=3e-2)
    print("KERNEL_OK")
</pallas_src>

<mosaic_0001>
module attributes {stable_mosaic.version = 11 : i64} {
  func.func @kernel(%arg0: memref<64x16xbf16, #tpu.memory_space<vmem>>, %arg1: memref<16x32xbf16, #tpu.memory_space<vmem>>, %arg2: memref<1x32xf32, #tpu.memory_space<vmem>>, %arg3: memref<32x256xbf16, #tpu.memory_space<vmem>>, %arg4: memref<64x256xbf16, #tpu.memory_space<vmem>>, %arg5: memref<1x256xf32, #tpu.memory_space<vmem>>, %arg6: memref<64x256xbf16, #tpu.memory_space<vmem>>, %arg7: memref<64x256xbf16, #tpu.memory_space<vmem>>, %arg8: memref<1x256xf32, #tpu.memory_space<vmem>>, %arg9: memref<64x128xbf16, #tpu.memory_space<vmem>>, %arg10: memref<1x128xf32, #tpu.memory_space<vmem>>, %arg11: memref<8x128xf32, #tpu.memory_space<vmem>>, %arg12: memref<64x64xf32, #tpu.memory_space<vmem>>) attributes {dimension_semantics = [], scalar_prefetch = 0 : i64, scratch_operands = 1 : i64, tpu.core_type = #tpu.core_type<tc>} {
    %0 = tpu.iota {dimensions = array<i32: 1>} : vector<8x256xi32>
    %c128_i32 = arith.constant 128 : i32
    %1 = vector.broadcast %c128_i32 : i32 to vector<8x256xi32>
    %2 = arith.cmpi sge, %0, %1 : vector<8x256xi32>
    %c192_i32 = arith.constant 192 : i32
    %3 = vector.broadcast %c192_i32 : i32 to vector<8x256xi32>
    %4 = arith.cmpi slt, %0, %3 : vector<8x256xi32>
    %5 = arith.andi %2, %4 : vector<8x256xi1>
    %cst = arith.constant 1.000000e+00 : f32
    %cst_0 = arith.constant 5.000000e-01 : f32
    %6 = vector.broadcast %cst : f32 to vector<8x256xf32>
    %7 = vector.broadcast %cst_0 : f32 to vector<8x256xf32>
    %8 = arith.select %5, %6, %7 : vector<8x256xi1>, vector<8x256xf32>
    %cst_1 = arith.constant 0.000000e+00 : f32
    %cst_2 = arith.constant 5.000000e-01 : f32
    %9 = vector.broadcast %cst_1 : f32 to vector<8x256xf32>
    %10 = vector.broadcast %cst_2 : f32 to vector<8x256xf32>
    %11 = arith.select %5, %9, %10 : vector<8x256xi1>, vector<8x256xf32>
    %c64_i32 = arith.constant 64 : i32
    %c0_i32 = arith.constant 0 : i32
    %12 = arith.cmpi eq, %c64_i32, %c0_i32 : i32
    %c1_i32 = arith.constant 1 : i32
    %13 = arith.select %12, %c1_i32, %c64_i32 : i32
    %14 = vector.broadcast %13 : i32 to vector<8x256xi32>
    %15 = arith.remsi %0, %14 : vector<8x256xi32>
    %c0_i32_3 = arith.constant 0 : i32
    %16 = vector.broadcast %c0_i32_3 : i32 to vector<8x256xi32>
    %17 = arith.cmpi ne, %15, %16 : vector<8x256xi32>
    %c0_i32_4 = arith.constant 0 : i32
    %18 = vector.broadcast %c0_i32_4 : i32 to vector<8x256xi32>
    %19 = arith.cmpi slt, %15, %18 : vector<8x256xi32>
    %c0_i32_5 = arith.constant 0 : i32
    %20 = arith.cmpi slt, %13, %c0_i32_5 : i32
    %21 = vector.broadcast %20 : i1 to vector<8x256xi1>
    %22 = vector.broadcast %21 : vector<8x256xi1> to vector<8x256xi1>
    %23 = arith.xori %19, %22 : vector<8x256xi1>
    %24 = arith.andi %23, %17 : vector<8x256xi1>
    %25 = vector.broadcast %13 : i32 to vector<8x256xi32>
    %26 = arith.addi %15, %25 : vector<8x256xi32>
    %27 = arith.select %24, %26, %15 : vector<8x256xi1>, vector<8x256xi32>
    %c32_i32 = arith.constant 32 : i32
    %28 = vector.broadcast %c32_i32 : i32 to vector<8x256xi32>
    %29 = arith.cmpi slt, %27, %28 : vector<8x256xi32>
    %30 = tpu.iota {dimensions = array<i32: 1>} : vector<8x64xi32>
    %c32_i32_6 = arith.constant 32 : i32
    %31 = vector.broadcast %c32_i32_6 : i32 to vector<8x64xi32>
    %32 = arith.cmpi slt, %30, %31 : vector<8x64xi32>
    %c0 = arith.constant 0 : index
    %c0_7 = arith.constant 0 : index
    %33 = vector.load %arg0[%c0, %c0_7] : memref<64x16xbf16, #tpu.memory_space<vmem>>, vector<64x16xbf16>
    %c0_8 = arith.constant 0 : index
    %c0_9 = arith.constant 0 : index
    %34 = vector.load %arg1[%c0_8, %c0_9] : memref<16x32xbf16, #tpu.memory_space<vmem>>, vector<16x32xbf16>
    %cst_10 = arith.constant dense<0.000000e+00> : vector<64x32xf32>
    %35 = tpu.matmul %33, %34, %cst_10 {dimension_numbers = #tpu.dot_dimension_numbers<[1], [0], [0], [1], [0, 0, 1, 1], [], []>} : vector<64x16xbf16>, vector<16x32xbf16>, vector<64x32xf32> -> vector<64x32xf32>
    %c0_11 = arith.constant 0 : index
    %c0_12 = arith.constant 0 : index
    %36 = vector.load %arg2[%c0_11, %c0_12] : memref<1x32xf32, #tpu.memory_space<vmem>>, vector<1x32xf32>
    %37 = vector.broadcast %36 : vector<1x32xf32> to vector<64x32xf32>
    %38 = arith.addf %35, %37 : vector<64x32xf32>
    %cst_13 = arith.constant 0.000000e+00 : f32
    %39 = vector.broadcast %cst_13 : f32 to vector<8x64xf32>
    %40 = arith.truncf %38 : vector<64x32xf32> to vector<64x32xbf16>
    %c0_14 = arith.constant 0 : index
    %c0_15 = arith.constant 0 : index
    %41 = vector.load %arg3[%c0_14, %c0_15] : memref<32x256xbf16, #tpu.memory_space<vmem>>, vector<32x256xbf16>
    %cst_16 = arith.constant dense<0.000000e+00> : vector<64x256xf32>
    %42 = tpu.matmul %40, %41, %cst_16 {dimension_numbers = #tpu.dot_dimension_numbers<[1], [0], [0], [1], [0, 0, 1, 1], [], []>} : vector<64x32xbf16>, vector<32x256xbf16>, vector<64x256xf32> -> vector<64x256xf32>
    %c0_17 = arith.constant 0 : index
    %c0_18 = arith.constant 0 : index
    %43 = vector.load %arg5[%c0_17, %c0_18] : memref<1x256xf32, #tpu.memory_space<vmem>>, vector<1x256xf32>
    %44 = vector.broadcast %43 : vector<1x256xf32> to vector<64x256xf32>
    %45 = arith.addf %42, %44 : vector<64x256xf32>
    %c0_19 = arith.constant 0 : index
    %c0_20 = arith.constant 0 : index
    %46 = vector.load %arg4[%c0_19, %c0_20] : memref<64x256xbf16, #tpu.memory_space<vmem>>, vector<64x256xbf16>
    %47 = vector.extract_strided_slice %45 {offsets = [0, 0], sizes = [8, 256], strides = [1, 1]} : vector<64x256xf32> to vector<8x256xf32>
    %48 = vector.extract_strided_slice %45 {offsets = [56, 0], sizes = [8, 256], strides = [1, 1]} : vector<64x256xf32> to vector<8x256xf32>
    %49 = arith.select %29, %47, %48 : vector<8x256xi1>, vector<8x256xf32>
    %50 = arith.mulf %49, %8 : vector<8x256xf32>
    %51 = math.tanh %50 : vector<8x256xf32>
    %52 = arith.mulf %51, %8 : vector<8x256xf32>
    %53 = arith.addf %52, %11 : vector<8x256xf32>
    %54 = vector.extract_strided_slice %53 {offsets = [0, 64], sizes = [8, 64], strides = [1, 1]} : vector<8x256xf32> to vector<8x64xf32>
    %55 = arith.mulf %54, %39 : vector<8x64xf32>
    %56 = vector.extract_strided_slice %53 {offsets = [0, 0], sizes = [8, 64], strides = [1, 1]} : vector<8x256xf32> to vector<8x64xf32>
    %57 = vector.extract_strided_slice %53 {offsets = [0, 128], sizes = [8, 64], strides = [1, 1]} : vector<8x256xf32> to vector<8x64xf32>
    %58 = arith.mulf %56, %57 : vector<8x64xf32>
    %59 = arith.addf %55, %58 : vector<8x64xf32>
    %60 = vector.extract_strided_slice %53 {offsets = [0, 192], sizes = [8, 64], strides = [1, 1]} : vector<8x256xf32> to vector<8x64xf32>
    %61 = math.tanh %59 : vector<8x64xf32>
    %62 = arith.mulf %60, %61 : vector<8x64xf32>
    %63 = vector.extract_strided_slice %62 {offsets = [0, 0], sizes = [8, 32], strides = [1, 1]} : vector<8x64xf32> to vector<8x32xf32>
    %c0_21 = arith.constant 0 : index
    %c0_22 = arith.constant 0 : index
    %64 = vector.load %arg12[%c0_21, %c0_22] : memref<64x64xf32, #tpu.memory_space<vmem>>, vector<8x32xf32>
    tpu.vector_store %arg12[%c0_21, %c0_22], %63 {strides = array<i32>} : memref<64x64xf32, #tpu.memory_space<vmem>>, vector<8x32xf32>,
    %65 = vector.extract_strided_slice %62 {offsets = [0, 32], sizes = [8, 32], strides = [1, 1]} : vector<8x64xf32> to vector<8x32xf32>
    %c56 = arith.constant 56 : index
    %c32 = arith.constant 32 : index
    %66 = vector.load %arg12[%c56, %c32] : memref<64x64xf32, #tpu.memory_space<vmem>>, vector<8x32xf32>
    tpu.vector_store %arg12[%c56, %c32], %65 {strides = array<i32>} : memref<64x64xf32, #tpu.memory_space<vmem>>, vector<8x32xf32>,
    %67 = vector.extract_strided_slice %45 {offsets = [8, 0], sizes = [8, 256], strides = [1, 1]} : vector<64x256xf32> to vector<8x256xf32>
    %68 = vector.extract_strided_slice %45 {offsets = [48, 0], sizes = [8, 256], strides = [1, 1]} : vector<64x256xf32> to vector<8x256xf32>
    %69 = arith.select %29, %67, %68 : vector<8x256xi1>, vector<8x256xf32>
    %70 = arith.truncf %62 : vector<8x64xf32> to vector<8x64xbf16>
    %cst_23 = arith.constant dense<0.000000e+00> : vector<8x256xf32>
    %71 = tpu.matmul %70, %46, %cst_23 {dimension_numbers = #tpu.dot_dimension_numbers<[1], [0], [0], [1], [0, 0, 1, 1], [], []>} : vector<8x64xbf16>, vector<64x256xbf16>, vector<8x256xf32> -> vector<8x256xf32>
    %72 = arith.addf %69, %71 : vector<8x256xf32>
    %73 = arith.mulf %72, %8 : vector<8x256xf32>
    %74 = math.tanh %73 : vector<8x256xf32>
    %75 = arith.mulf %74, %8 : vector<8x256xf32>
    %76 = arith.addf %75, %11 : vector<8x256xf32>
    %77 = vector.extract_strided_slice %76 {offsets = [0, 64], sizes = [8, 64], strides = [1, 1]} : vector<8x256xf32> to vector<8x64xf32>
    %78 = arith.mulf %77, %59 : vector<8x64xf32>
    %79 = vector.extract_strided_slice %76 {offsets = [0, 0], sizes = [8, 64], strides = [1, 1]} : vector<8x256xf32> to vector<8x64xf32>
    %80 = vector.extract_strided_slice %76 {offsets = [0, 128], sizes = [8, 64], strides = [1, 1]} : vector<8x256xf32> to vector<8x64xf32>
    %81 = arith.mulf %79, %80 : vector<8x64xf32>
    %82 = arith.addf %78, %81 : vector<8x64xf32>
    %83 = vector.extract_strided_slice %76 {offsets = [0, 192], sizes = [8, 64], strides = [1, 1]} : vector<8x256xf32> to vector<8x64xf32>
    %84 = math.tanh %82 : vector<8x64xf32>
    %85 = arith.mulf %83, %84 : vector<8x64xf32>
    %86 = vector.extract_strided_slice %85 {offsets = [0, 0], sizes = [8, 32], strides = [1, 1]} : vector<8x64xf32> to vector<8x32xf32>
    %c8 = arith.constant 8 : index
    %c0_24 = arith.constant 0 : index
    %87 = vector.load %arg12[%c8, %c0_24] : memref<64x64xf32, #tpu.memory_space<vmem>>, vector<8x32xf32>
    tpu.vector_store %arg12[%c8, %c0_24], %86 {strides = array<i32>} : memref<64x64xf32, #tpu.memory_space<vmem>>, vector<8x32xf32>,
    %88 = vector.extract_strided_slice %85 {offsets = [0, 32], sizes = [8, 32], strides = [1, 1]} : vector<8x64xf32> to vector<8x32xf32>
    %c48 = arith.constant 48 : index
    %c32_25 = arith.constant 32 : index
    %89 = vector.load %arg12[%c48, %c32_25] : memref<64x64xf32, #tpu.memory_space<vmem>>, vector<8x32xf32>
    tpu.vector_store %arg12[%c48, %c32_25], %88 {strides = array<i32>} : memref<64x64xf32, #tpu.memory_space<vmem>>, vector<8x32xf32>,
    %90 = vector.extract_strided_slice %45 {offsets = [16, 0], sizes = [8, 256], strides = [1, 1]} : vector<64x256xf32> to vector<8x256xf32>
    %91 = vector.extract_strided_slice %45 {offsets = [40, 0], sizes = [8, 256], strides = [1, 1]} : vector<64x256xf32> to vector<8x256xf32>
    %92 = arith.select %29, %90, %91 : vector<8x256xi1>, vector<8x256xf32>
    %93 = arith.truncf %85 : vector<8x64xf32> to vector<8x64xbf16>
    %cst_26 = arith.constant dense<0.000000e+00> : vector<8x256xf32>
    %94 = tpu.matmul %93, %46, %cst_26 {dimension_numbers = #tpu.dot_dimension_numbers<[1], [0], [0], [1], [0, 0, 1, 1], [], []>} : vector<8x64xbf16>, vector<64x256xbf16>, vector<8x256xf32> -> vector<8x256xf32>
    %95 = arith.addf %92, %94 : vector<8x256xf32>
    %96 = arith.mulf %95, %8 : vector<8x256xf32>
    %97 = math.tanh %96 : vector<8x256xf32>
    %98 = arith.mulf %97, %8 : vector<8x256xf32>
    %99 = arith.addf %98, %11 : vector<8x256xf32>
    %100 = vector.extract_strided_slice %99 {offsets = [0, 64], sizes = [8, 64], strides = [1, 1]} : vector<8x256xf32> to vector<8x64xf32>
    %101 = arith.mulf %100, %82 : vector<8x64xf32>
    %102 = vector.extract_strided_slice %99 {offsets = [0, 0], sizes = [8, 64], strides = [1, 1]} : vector<8x256xf32> to vector<8x64xf32>
    %103 = vector.extract_strided_slice %99 {offsets = [0, 128], sizes = [8, 64], strides = [1, 1]} : vector<8x256xf32> to vector<8x64xf32>
    %104 = arith.mulf %102, %103 : vector<8x64xf32>
    %105 = arith.addf %101, %104 : vector<8x64xf32>
    %106 = vector.extract_strided_slice %99 {offsets = [0, 192], sizes = [8, 64], strides = [1, 1]} : vector<8x256xf32> to vector<8x64xf32>
    %107 = math.tanh %105 : vector<8x64xf32>
    %108 = arith.mulf %106, %107 : vector<8x64xf32>
    %109 = vector.extract_strided_slice %108 {offsets = [0, 0], sizes = [8, 32], strides = [1, 1]} : vector<8x64xf32> to vector<8x32xf32>
    %c16 = arith.constant 16 : index
    %c0_27 = arith.constant 0 : index
    %110 = vector.load %arg12[%c16, %c0_27] : memref<64x64xf32, #tpu.memory_space<vmem>>, vector<8x32xf32>
    tpu.vector_store %arg12[%c16, %c0_27], %109 {strides = array<i32>} : memref<64x64xf32, #tpu.memory_space<vmem>>, vector<8x32xf32>,
    %111 = vector.extract_strided_slice %108 {offsets = [0, 32], sizes = [8, 32], strides = [1, 1]} : vector<8x64xf32> to vector<8x32xf32>
    %c40 = arith.constant 40 : index
    %c32_28 = arith.constant 32 : index
    %112 = vector.load %arg12[%c40, %c32_28] : memref<64x64xf32, #tpu.memory_space<vmem>>, vector<8x32xf32>
    tpu.vector_store %arg12[%c40, %c32_28], %111 {strides = array<i32>} : memref<64x64xf32, #tpu.memory_space<vmem>>, vector<8x32xf32>,
    %113 = vector.extract_strided_slice %45 {offsets = [24, 0], sizes = [8, 256], strides = [1, 1]} : vector<64x256xf32> to vector<8x256xf32>
    %114 = vector.extract_strided_slice %45 {offsets = [32, 0], sizes = [8, 256], strides = [1, 1]} : vector<64x256xf32> to vector<8x256xf32>
    %115 = arith.select %29, %113, %114 : vector<8x256xi1>, vector<8x256xf32>
    %116 = arith.truncf %108 : vector<8x64xf32> to vector<8x64xbf16>
    %cst_29 = arith.constant dense<0.000000e+00> : vector<8x256xf32>
    %117 = tpu.matmul %116, %46, %cst_29 {dimension_numbers = #tpu.dot_dimension_numbers<[1], [0], [0], [1], [0, 0, 1, 1], [], []>} : vector<8x64xbf16>, vector<64x256xbf16>, vector<8x256xf32> -> vector<8x256xf32>
    %118 = arith.addf %115, %117 : vector<8x256xf32>
    %119 = arith.mulf %118, %8 : vector<8x256xf32>
    %120 = math.tanh %119 : vector<8x256xf32>
    %121 = arith.mulf %120, %8 : vector<8x256xf32>
    %122 = arith.addf %121, %11 : vector<8x256xf32>
    %123 = vector.extract_strided_slice %122 {offsets = [0, 64], sizes = [8, 64], strides = [1, 1]} : vector<8x256xf32> to vector<8x64xf32>
    %124 = arith.mulf %123, %105 : vector<8x64xf32>
    %125 = vector.extract_strided_slice %122 {offsets = [0, 0], sizes = [8, 64], strides = [1, 1]} : vector<8x256xf32> to vector<8x64xf32>
    %126 = vector.extract_strided_slice %122 {offsets = [0, 128], sizes = [8, 64], strides = [1, 1]} : vector<8x256xf32> to vector<8x64xf32>
    %127 = arith.mulf %125, %126 : vector<8x64xf32>
    %128 = arith.addf %124, %127 : vector<8x64xf32>
    %129 = vector.extract_strided_slice %122 {offsets = [0, 192], sizes = [8, 64], strides = [1, 1]} : vector<8x256xf32> to vector<8x64xf32>
    %130 = math.tanh %128 : vector<8x64xf32>
    %131 = arith.mulf %129, %130 : vector<8x64xf32>
    %132 = vector.extract_strided_slice %131 {offsets = [0, 0], sizes = [8, 32], strides = [1, 1]} : vector<8x64xf32> to vector<8x32xf32>
    %c24 = arith.constant 24 : index
    %c0_30 = arith.constant 0 : index
    %133 = vector.load %arg12[%c24, %c0_30] : memref<64x64xf32, #tpu.memory_space<vmem>>, vector<8x32xf32>
    tpu.vector_store %arg12[%c24, %c0_30], %132 {strides = array<i32>} : memref<64x64xf32, #tpu.memory_space<vmem>>, vector<8x32xf32>,
    %134 = vector.extract_strided_slice %131 {offsets = [0, 32], sizes = [8, 32], strides = [1, 1]} : vector<8x64xf32> to vector<8x32xf32>
    %c32_31 = arith.constant 32 : index
    %c32_32 = arith.constant 32 : index
    %135 = vector.load %arg12[%c32_31, %c32_32] : memref<64x64xf32, #tpu.memory_space<vmem>>, vector<8x32xf32>
    tpu.vector_store %arg12[%c32_31, %c32_32], %134 {strides = array<i32>} : memref<64x64xf32, #tpu.memory_space<vmem>>, vector<8x32xf32>,
    %136 = vector.extract_strided_slice %45 {offsets = [32, 0], sizes = [8, 256], strides = [1, 1]} : vector<64x256xf32> to vector<8x256xf32>
    %137 = vector.extract_strided_slice %45 {offsets = [24, 0], sizes = [8, 256], strides = [1, 1]} : vector<64x256xf32> to vector<8x256xf32>
    %138 = arith.select %29, %136, %137 : vector<8x256xi1>, vector<8x256xf32>
    %139 = arith.truncf %131 : vector<8x64xf32> to vector<8x64xbf16>
    %cst_33 = arith.constant dense<0.000000e+00> : vector<8x256xf32>
    %140 = tpu.matmul %139, %46, %cst_33 {dimension_numbers = #tpu.dot_dimension_numbers<[1], [0], [0], [1], [0, 0, 1, 1], [], []>} : vector<8x64xbf16>, vector<64x256xbf16>, vector<8x256xf32> -> vector<8x256xf32>
    %141 = arith.addf %138, %140 : vector<8x256xf32>
    %142 = arith.mulf %141, %8 : vector<8x256xf32>
    %143 = math.tanh %142 : vector<8x256xf32>
    %144 = arith.mulf %143, %8 : vector<8x256xf32>
    %145 = arith.addf %144, %11 : vector<8x256xf32>
    %146 = vector.extract_strided_slice %145 {offsets = [0, 64], sizes = [8, 64], strides = [1, 1]} : vector<8x256xf32> to vector<8x64xf32>
    %147 = arith.mulf %146, %128 : vector<8x64xf32>
    %148 = vector.extract_strided_slice %145 {offsets = [0, 0], sizes = [8, 64], strides = [1, 1]} : vector<8x256xf32> to vector<8x64xf32>
    %149 = vector.extract_strided_slice %145 {offsets = [0, 128], sizes = [8, 64], strides = [1, 1]} : vector<8x256xf32> to vector<8x64xf32>
    %150 = arith.mulf %148, %149 : vector<8x64xf32>
    %151 = arith.addf %147, %150 : vector<8x64xf32>
    %152 = vector.extract_strided_slice %145 {offsets = [0, 192], sizes = [8, 64], strides = [1, 1]} : vector<8x256xf32> to vector<8x64xf32>
    %153 = math.tanh %151 : vector<8x64xf32>
    %154 = arith.mulf %152, %153 : vector<8x64xf32>
    %155 = vector.extract_strided_slice %154 {offsets = [0, 0], sizes = [8, 32], strides = [1, 1]} : vector<8x64xf32> to vector<8x32xf32>
    %c32_34 = arith.constant 32 : index
    %c0_35 = arith.constant 0 : index
    %156 = vector.load %arg12[%c32_34, %c0_35] : memref<64x64xf32, #tpu.memory_space<vmem>>, vector<8x32xf32>
    tpu.vector_store %arg12[%c32_34, %c0_35], %155 {strides = array<i32>} : memref<64x64xf32, #tpu.memory_space<vmem>>, vector<8x32xf32>,
    %157 = vector.extract_strided_slice %154 {offsets = [0, 32], sizes = [8, 32], strides = [1, 1]} : vector<8x64xf32> to vector<8x32xf32>
    %c24_36 = arith.constant 24 : index
    %c32_37 = arith.constant 32 : index
    %158 = vector.load %arg12[%c24_36, %c32_37] : memref<64x64xf32, #tpu.memory_space<vmem>>, vector<8x32xf32>
    tpu.vector_store %arg12[%c24_36, %c32_37], %157 {strides = array<i32>} : memref<64x64xf32, #tpu.memory_space<vmem>>, vector<8x32xf32>,
    %159 = vector.extract_strided_slice %45 {offsets = [40, 0], sizes = [8, 256], strides = [1, 1]} : vector<64x256xf32> to vector<8x256xf32>
    %160 = vector.extract_strided_slice %45 {offsets = [16, 0], sizes = [8, 256], strides = [1, 1]} : vector<64x256xf32> to vector<8x256xf32>
    %161 = arith.select %29, %159, %160 : vector<8x256xi1>, vector<8x256xf32>
    %162 = arith.truncf %154 : vector<8x64xf32> to vector<8x64xbf16>
    %cst_38 = arith.constant dense<0.000000e+00> : vector<8x256xf32>
    %163 = tpu.matmul %162, %46, %cst_38 {dimension_numbers = #tpu.dot_dimension_numbers<[1], [0], [0], [1], [0, 0, 1, 1], [], []>} : vector<8x64xbf16>, vector<64x256xbf16>, vector<8x256xf32> -> vector<8x256xf32>
    %164 = arith.addf %161, %163 : vector<8x256xf32>
    %165 = arith.mulf %164, %8 : vector<8x256xf32>
    %166 = math.tanh %165 : vector<8x256xf32>
    %167 = arith.mulf %166, %8 : vector<8x256xf32>
    %168 = arith.addf %167, %11 : vector<8x256xf32>
    %169 = vector.extract_strided_slice %168 {offsets = [0, 64], sizes = [8, 64], strides = [1, 1]} : vector<8x256xf32> to vector<8x64xf32>
    %170 = arith.mulf %169, %151 : vector<8x64xf32>
    %171 = vector.extract_strided_slice %168 {offsets = [0, 0], sizes = [8, 64], strides = [1, 1]} : vector<8x256xf32> to vector<8x64xf32>
    %172 = vector.extract_strided_slice %168 {offsets = [0, 128], sizes = [8, 64], strides = [1, 1]} : vector<8x256xf32> to vector<8x64xf32>
    %173 = arith.mulf %171, %172 : vector<8x64xf32>
    %174 = arith.addf %170, %173 : vector<8x64xf32>
    %175 = vector.extract_strided_slice %168 {offsets = [0, 192], sizes = [8, 64], strides = [1, 1]} : vector<8x256xf32> to vector<8x64xf32>
    %176 = math.tanh %174 : vector<8x64xf32>
    %177 = arith.mulf %175, %176 : vector<8x64xf32>
    %178 = vector.extract_strided_slice %177 {offsets = [0, 0], sizes = [8, 32], strides = [1, 1]} : vector<8x64xf32> to vector<8x32xf32>
    %c40_39 = arith.constant 40 : index
    %c0_40 = arith.constant 0 : index
    %179 = vector.load %arg12[%c40_39, %c0_40] : memref<64x64xf32, #tpu.memory_space<vmem>>, vector<8x32xf32>
    tpu.vector_store %arg12[%c40_39, %c0_40], %178 {strides = array<i32>} : memref<64x64xf32, #tpu.memory_space<vmem>>, vector<8x32xf32>,
    %180 = vector.extract_strided_slice %177 {offsets = [0, 32], sizes = [8, 32], strides = [1, 1]} : vector<8x64xf32> to vector<8x32xf32>
    %c16_41 = arith.constant 16 : index
    %c32_42 = arith.constant 32 : index
    %181 = vector.load %arg12[%c16_41, %c32_42] : memref<64x64xf32, #tpu.memory_space<vmem>>, vector<8x32xf32>
    tpu.vector_store %arg12[%c16_41, %c32_42], %180 {strides = array<i32>} : memref<64x64xf32, #tpu.memory_space<vmem>>, vector<8x32xf32>,
    %182 = vector.extract_strided_slice %45 {offsets = [48, 0], sizes = [8, 256], strides = [1, 1]} : vector<64x256xf32> to vector<8x256xf32>
    %183 = vector.extract_strided_slice %45 {offsets = [8, 0], sizes = [8, 256], strides = [1, 1]} : vector<64x256xf32> to vector<8x256xf32>
    %184 = arith.select %29, %182, %183 : vector<8x256xi1>, vector<8x256xf32>
    %185 = arith.truncf %177 : vector<8x64xf32> to vector<8x64xbf16>
    %cst_43 = arith.constant dense<0.000000e+00> : vector<8x256xf32>
    %186 = tpu.matmul %185, %46, %cst_43 {dimension_numbers = #tpu.dot_dimension_numbers<[1], [0], [0], [1], [0, 0, 1, 1], [], []>} : vector<8x64xbf16>, vector<64x256xbf16>, vector<8x256xf32> -> vector<8x256xf32>
    %187 = arith.addf %184, %186 : vector<8x256xf32>
    %188 = arith.mulf %187, %8 : vector<8x256xf32>
    %189 = math.tanh %188 : vector<8x256xf32>
    %190 = arith.mulf %189, %8 : vector<8x256xf32>
    %191 = arith.addf %190, %11 : vector<8x256xf32>
    %192 = vector.extract_strided_slice %191 {offsets = [0, 64], sizes = [8, 64], strides = [1, 1]} : vector<8x256xf32> to vector<8x64xf32>
    %193 = arith.mulf %192, %174 : vector<8x64xf32>
    %194 = vector.extract_strided_slice %191 {offsets = [0, 0], sizes = [8, 64], strides = [1, 1]} : vector<8x256xf32> to vector<8x64xf32>
    %195 = vector.extract_strided_slice %191 {offsets = [0, 128], sizes = [8, 64], strides = [1, 1]} : vector<8x256xf32> to vector<8x64xf32>
    %196 = arith.mulf %194, %195 : vector<8x64xf32>
    %197 = arith.addf %193, %196 : vector<8x64xf32>
    %198 = vector.extract_strided_slice %191 {offsets = [0, 192], sizes = [8, 64], strides = [1, 1]} : vector<8x256xf32> to vector<8x64xf32>
    %199 = math.tanh %197 : vector<8x64xf32>
    %200 = arith.mulf %198, %199 : vector<8x64xf32>
    %201 = vector.extract_strided_slice %200 {offsets = [0, 0], sizes = [8, 32], strides = [1, 1]} : vector<8x64xf32> to vector<8x32xf32>
    %c48_44 = arith.constant 48 : index
    %c0_45 = arith.constant 0 : index
    %202 = vector.load %arg12[%c48_44, %c0_45] : memref<64x64xf32, #tpu.memory_space<vmem>>, vector<8x32xf32>
    tpu.vector_store %arg12[%c48_44, %c0_45], %201 {strides = array<i32>} : memref<64x64xf32, #tpu.memory_space<vmem>>, vector<8x32xf32>,
    %203 = vector.extract_strided_slice %200 {offsets = [0, 32], sizes = [8, 32], strides = [1, 1]} : vector<8x64xf32> to vector<8x32xf32>
    %c8_46 = arith.constant 8 : index
    %c32_47 = arith.constant 32 : index
    %204 = vector.load %arg12[%c8_46, %c32_47] : memref<64x64xf32, #tpu.memory_space<vmem>>, vector<8x32xf32>
    tpu.vector_store %arg12[%c8_46, %c32_47], %203 {strides = array<i32>} : memref<64x64xf32, #tpu.memory_space<vmem>>, vector<8x32xf32>,
    %205 = vector.extract_strided_slice %45 {offsets = [56, 0], sizes = [8, 256], strides = [1, 1]} : vector<64x256xf32> to vector<8x256xf32>
    %206 = vector.extract_strided_slice %45 {offsets = [0, 0], sizes = [8, 256], strides = [1, 1]} : vector<64x256xf32> to vector<8x256xf32>
    %207 = arith.select %29, %205, %206 : vector<8x256xi1>, vector<8x256xf32>
    %208 = arith.truncf %200 : vector<8x64xf32> to vector<8x64xbf16>
    %cst_48 = arith.constant dense<0.000000e+00> : vector<8x256xf32>
    %209 = tpu.matmul %208, %46, %cst_48 {dimension_numbers = #tpu.dot_dimension_numbers<[1], [0], [0], [1], [0, 0, 1, 1], [], []>} : vector<8x64xbf16>, vector<64x256xbf16>, vector<8x256xf32> -> vector<8x256xf32>
    %210 = arith.addf %207, %209 : vector<8x256xf32>
    %211 = arith.mulf %210, %8 : vector<8x256xf32>
    %212 = math.tanh %211 : vector<8x256xf32>
    %213 = arith.mulf %212, %8 : vector<8x256xf32>
    %214 = arith.addf %213, %11 : vector<8x256xf32>
    %215 = vector.extract_strided_slice %214 {offsets = [0, 64], sizes = [8, 64], strides = [1, 1]} : vector<8x256xf32> to vector<8x64xf32>
    %216 = arith.mulf %215, %197 : vector<8x64xf32>
    %217 = vector.extract_strided_slice %214 {offsets = [0, 0], sizes = [8, 64], strides = [1, 1]} : vector<8x256xf32> to vector<8x64xf32>
    %218 = vector.extract_strided_slice %214 {offsets = [0, 128], sizes = [8, 64], strides = [1, 1]} : vector<8x256xf32> to vector<8x64xf32>
    %219 = arith.mulf %217, %218 : vector<8x64xf32>
    %220 = arith.addf %216, %219 : vector<8x64xf32>
    %221 = vector.extract_strided_slice %214 {offsets = [0, 192], sizes = [8, 64], strides = [1, 1]} : vector<8x256xf32> to vector<8x64xf32>
    %222 = math.tanh %220 : vector<8x64xf32>
    %223 = arith.mulf %221, %222 : vector<8x64xf32>
    %224 = vector.extract_strided_slice %223 {offsets = [0, 0], sizes = [8, 32], strides = [1, 1]} : vector<8x64xf32> to vector<8x32xf32>
    %c56_49 = arith.constant 56 : index
    %c0_50 = arith.constant 0 : index
    %225 = vector.load %arg12[%c56_49, %c0_50] : memref<64x64xf32, #tpu.memory_space<vmem>>, vector<8x32xf32>
    tpu.vector_store %arg12[%c56_49, %c0_50], %224 {strides = array<i32>} : memref<64x64xf32, #tpu.memory_space<vmem>>, vector<8x32xf32>,
    %226 = vector.extract_strided_slice %223 {offsets = [0, 32], sizes = [8, 32], strides = [1, 1]} : vector<8x64xf32> to vector<8x32xf32>
    %c0_51 = arith.constant 0 : index
    %c32_52 = arith.constant 32 : index
    %227 = vector.load %arg12[%c0_51, %c32_52] : memref<64x64xf32, #tpu.memory_space<vmem>>, vector<8x32xf32>
    tpu.vector_store %arg12[%c0_51, %c32_52], %226 {strides = array<i32>} : memref<64x64xf32, #tpu.memory_space<vmem>>, vector<8x32xf32>,
    %c0_53 = arith.constant 0 : index
    %c0_54 = arith.constant 0 : index
    %228 = vector.load %arg12[%c0_53, %c0_54] : memref<64x64xf32, #tpu.memory_space<vmem>>, vector<64x64xf32>
    %229 = arith.truncf %228 : vector<64x64xf32> to vector<64x64xbf16>
    %c0_55 = arith.constant 0 : index
    %c0_56 = arith.constant 0 : index
    %230 = vector.load %arg6[%c0_55, %c0_56] : memref<64x256xbf16, #tpu.memory_space<vmem>>, vector<64x256xbf16>
    %cst_57 = arith.constant dense<0.000000e+00> : vector<64x256xf32>
    %231 = tpu.matmul %229, %230, %cst_57 {dimension_numbers = #tpu.dot_dimension_numbers<[1], [0], [0], [1], [0, 0, 1, 1], [], []>} : vector<64x64xbf16>, vector<64x256xbf16>, vector<64x256xf32> -> vector<64x256xf32>
    %c0_58 = arith.constant 0 : index
    %c0_59 = arith.constant 0 : index
    %232 = vector.load %arg8[%c0_58, %c0_59] : memref<1x256xf32, #tpu.memory_space<vmem>>, vector<1x256xf32>
    %233 = vector.broadcast %232 : vector<1x256xf32> to vector<64x256xf32>
    %234 = arith.addf %231, %233 : vector<64x256xf32>
    %c0_60 = arith.constant 0 : index
    %c0_61 = arith.constant 0 : index
    %235 = vector.load %arg7[%c0_60, %c0_61] : memref<64x256xbf16, #tpu.memory_space<vmem>>, vector<64x256xbf16>
    %236 = vector.extract_strided_slice %234 {offsets = [0, 0], sizes = [8, 256], strides = [1, 1]} : vector<64x256xf32> to vector<8x256xf32>
    %237 = vector.extract_strided_slice %234 {offsets = [56, 0], sizes = [8, 256], strides = [1, 1]} : vector<64x256xf32> to vector<8x256xf32>
    %238 = arith.select %29, %236, %237 : vector<8x256xi1>, vector<8x256xf32>
    %239 = arith.mulf %238, %8 : vector<8x256xf32>
    %240 = math.tanh %239 : vector<8x256xf32>
    %241 = arith.mulf %240, %8 : vector<8x256xf32>
    %242 = arith.addf %241, %11 : vector<8x256xf32>
    %243 = vector.extract_strided_slice %242 {offsets = [0, 64], sizes = [8, 64], strides = [1, 1]} : vector<8x256xf32> to vector<8x64xf32>
    %244 = arith.mulf %243, %39 : vector<8x64xf32>
    %245 = vector.extract_strided_slice %242 {offsets = [0, 0], sizes = [8, 64], strides = [1, 1]} : vector<8x256xf32> to vector<8x64xf32>
    %246 = vector.extract_strided_slice %242 {offsets = [0, 128], sizes = [8, 64], strides = [1, 1]} : vector<8x256xf32> to vector<8x64xf32>
    %247 = arith.mulf %245, %246 : vector<8x64xf32>
    %248 = arith.addf %244, %247 : vector<8x64xf32>
    %249 = vector.extract_strided_slice %242 {offsets = [0, 192], sizes = [8, 64], strides = [1, 1]} : vector<8x256xf32> to vector<8x64xf32>
    %250 = math.tanh %248 : vector<8x64xf32>
    %251 = arith.mulf %249, %250 : vector<8x64xf32>
    %252 = vector.extract_strided_slice %234 {offsets = [8, 0], sizes = [8, 256], strides = [1, 1]} : vector<64x256xf32> to vector<8x256xf32>
    %253 = vector.extract_strided_slice %234 {offsets = [48, 0], sizes = [8, 256], strides = [1, 1]} : vector<64x256xf32> to vector<8x256xf32>
    %254 = arith.select %29, %252, %253 : vector<8x256xi1>, vector<8x256xf32>
    %255 = arith.truncf %251 : vector<8x64xf32> to vector<8x64xbf16>
    %cst_62 = arith.constant dense<0.000000e+00> : vector<8x256xf32>
    %256 = tpu.matmul %255, %235, %cst_62 {dimension_numbers = #tpu.dot_dimension_numbers<[1], [0], [0], [1], [0, 0, 1, 1], [], []>} : vector<8x64xbf16>, vector<64x256xbf16>, vector<8x256xf32> -> vector<8x256xf32>
    %257 = arith.addf %254, %256 : vector<8x256xf32>
    %258 = arith.mulf %257, %8 : vector<8x256xf32>
    %259 = math.tanh %258 : vector<8x256xf32>
    %260 = arith.mulf %259, %8 : vector<8x256xf32>
    %261 = arith.addf %260, %11 : vector<8x256xf32>
    %262 = vector.extract_strided_slice %261 {offsets = [0, 64], sizes = [8, 64], strides = [1, 1]} : vector<8x256xf32> to vector<8x64xf32>
    %263 = arith.mulf %262, %248 : vector<8x64xf32>
    %264 = vector.extract_strided_slice %261 {offsets = [0, 0], sizes = [8, 64], strides = [1, 1]} : vector<8x256xf32> to vector<8x64xf32>
    %265 = vector.extract_strided_slice %261 {offsets = [0, 128], sizes = [8, 64], strides = [1, 1]} : vector<8x256xf32> to vector<8x64xf32>
    %266 = arith.mulf %264, %265 : vector<8x64xf32>
    %267 = arith.addf %263, %266 : vector<8x64xf32>
    %268 = vector.extract_strided_slice %261 {offsets = [0, 192], sizes = [8, 64], strides = [1, 1]} : vector<8x256xf32> to vector<8x64xf32>
    %269 = math.tanh %267 : vector<8x64xf32>
    %270 = arith.mulf %268, %269 : vector<8x64xf32>
    %271 = vector.extract_strided_slice %234 {offsets = [16, 0], sizes = [8, 256], strides = [1, 1]} : vector<64x256xf32> to vector<8x256xf32>
    %272 = vector.extract_strided_slice %234 {offsets = [40, 0], sizes = [8, 256], strides = [1, 1]} : vector<64x256xf32> to vector<8x256xf32>
    %273 = arith.select %29, %271, %272 : vector<8x256xi1>, vector<8x256xf32>
    %274 = arith.truncf %270 : vector<8x64xf32> to vector<8x64xbf16>
    %cst_63 = arith.constant dense<0.000000e+00> : vector<8x256xf32>
    %275 = tpu.matmul %274, %235, %cst_63 {dimension_numbers = #tpu.dot_dimension_numbers<[1], [0], [0], [1], [0, 0, 1, 1], [], []>} : vector<8x64xbf16>, vector<64x256xbf16>, vector<8x256xf32> -> vector<8x256xf32>
    %276 = arith.addf %273, %275 : vector<8x256xf32>
    %277 = arith.mulf %276, %8 : vector<8x256xf32>
    %278 = math.tanh %277 : vector<8x256xf32>
    %279 = arith.mulf %278, %8 : vector<8x256xf32>
    %280 = arith.addf %279, %11 : vector<8x256xf32>
    %281 = vector.extract_strided_slice %280 {offsets = [0, 64], sizes = [8, 64], strides = [1, 1]} : vector<8x256xf32> to vector<8x64xf32>
    %282 = arith.mulf %281, %267 : vector<8x64xf32>
    %283 = vector.extract_strided_slice %280 {offsets = [0, 0], sizes = [8, 64], strides = [1, 1]} : vector<8x256xf32> to vector<8x64xf32>
    %284 = vector.extract_strided_slice %280 {offsets = [0, 128], sizes = [8, 64], strides = [1, 1]} : vector<8x256xf32> to vector<8x64xf32>
    %285 = arith.mulf %283, %284 : vector<8x64xf32>
    %286 = arith.addf %282, %285 : vector<8x64xf32>
    %287 = vector.extract_strided_slice %280 {offsets = [0, 192], sizes = [8, 64], strides = [1, 1]} : vector<8x256xf32> to vector<8x64xf32>
    %288 = math.tanh %286 : vector<8x64xf32>
    %289 = arith.mulf %287, %288 : vector<8x64xf32>
    %290 = vector.extract_strided_slice %234 {offsets = [24, 0], sizes = [8, 256], strides = [1, 1]} : vector<64x256xf32> to vector<8x256xf32>
    %291 = vector.extract_strided_slice %234 {offsets = [32, 0], sizes = [8, 256], strides = [1, 1]} : vector<64x256xf32> to vector<8x256xf32>
    %292 = arith.select %29, %290, %291 : vector<8x256xi1>, vector<8x256xf32>
    %293 = arith.truncf %289 : vector<8x64xf32> to vector<8x64xbf16>
    %cst_64 = arith.constant dense<0.000000e+00> : vector<8x256xf32>
    %294 = tpu.matmul %293, %235, %cst_64 {dimension_numbers = #tpu.dot_dimension_numbers<[1], [0], [0], [1], [0, 0, 1, 1], [], []>} : vector<8x64xbf16>, vector<64x256xbf16>, vector<8x256xf32> -> vector<8x256xf32>
    %295 = arith.addf %292, %294 : vector<8x256xf32>
    %296 = arith.mulf %295, %8 : vector<8x256xf32>
    %297 = math.tanh %296 : vector<8x256xf32>
    %298 = arith.mulf %297, %8 : vector<8x256xf32>
    %299 = arith.addf %298, %11 : vector<8x256xf32>
    %300 = vector.extract_strided_slice %299 {offsets = [0, 64], sizes = [8, 64], strides = [1, 1]} : vector<8x256xf32> to vector<8x64xf32>
    %301 = arith.mulf %300, %286 : vector<8x64xf32>
    %302 = vector.extract_strided_slice %299 {offsets = [0, 0], sizes = [8, 64], strides = [1, 1]} : vector<8x256xf32> to vector<8x64xf32>
    %303 = vector.extract_strided_slice %299 {offsets = [0, 128], sizes = [8, 64], strides = [1, 1]} : vector<8x256xf32> to vector<8x64xf32>
    %304 = arith.mulf %302, %303 : vector<8x64xf32>
    %305 = arith.addf %301, %304 : vector<8x64xf32>
    %306 = vector.extract_strided_slice %299 {offsets = [0, 192], sizes = [8, 64], strides = [1, 1]} : vector<8x256xf32> to vector<8x64xf32>
    %307 = math.tanh %305 : vector<8x64xf32>
    %308 = arith.mulf %306, %307 : vector<8x64xf32>
    %309 = vector.extract_strided_slice %234 {offsets = [32, 0], sizes = [8, 256], strides = [1, 1]} : vector<64x256xf32> to vector<8x256xf32>
    %310 = vector.extract_strided_slice %234 {offsets = [24, 0], sizes = [8, 256], strides = [1, 1]} : vector<64x256xf32> to vector<8x256xf32>
    %311 = arith.select %29, %309, %310 : vector<8x256xi1>, vector<8x256xf32>
    %312 = arith.truncf %308 : vector<8x64xf32> to vector<8x64xbf16>
    %cst_65 = arith.constant dense<0.000000e+00> : vector<8x256xf32>
    %313 = tpu.matmul %312, %235, %cst_65 {dimension_numbers = #tpu.dot_dimension_numbers<[1], [0], [0], [1], [0, 0, 1, 1], [], []>} : vector<8x64xbf16>, vector<64x256xbf16>, vector<8x256xf32> -> vector<8x256xf32>
    %314 = arith.addf %311, %313 : vector<8x256xf32>
    %315 = arith.mulf %314, %8 : vector<8x256xf32>
    %316 = math.tanh %315 : vector<8x256xf32>
    %317 = arith.mulf %316, %8 : vector<8x256xf32>
    %318 = arith.addf %317, %11 : vector<8x256xf32>
    %319 = vector.extract_strided_slice %318 {offsets = [0, 64], sizes = [8, 64], strides = [1, 1]} : vector<8x256xf32> to vector<8x64xf32>
    %320 = arith.mulf %319, %305 : vector<8x64xf32>
    %321 = vector.extract_strided_slice %318 {offsets = [0, 0], sizes = [8, 64], strides = [1, 1]} : vector<8x256xf32> to vector<8x64xf32>
    %322 = vector.extract_strided_slice %318 {offsets = [0, 128], sizes = [8, 64], strides = [1, 1]} : vector<8x256xf32> to vector<8x64xf32>
    %323 = arith.mulf %321, %322 : vector<8x64xf32>
    %324 = arith.addf %320, %323 : vector<8x64xf32>
    %325 = vector.extract_strided_slice %318 {offsets = [0, 192], sizes = [8, 64], strides = [1, 1]} : vector<8x256xf32> to vector<8x64xf32>
    %326 = math.tanh %324 : vector<8x64xf32>
    %327 = arith.mulf %325, %326 : vector<8x64xf32>
    %328 = vector.extract_strided_slice %234 {offsets = [40, 0], sizes = [8, 256], strides = [1, 1]} : vector<64x256xf32> to vector<8x256xf32>
    %329 = vector.extract_strided_slice %234 {offsets = [16, 0], sizes = [8, 256], strides = [1, 1]} : vector<64x256xf32> to vector<8x256xf32>
    %330 = arith.select %29, %328, %329 : vector<8x256xi1>, vector<8x256xf32>
    %331 = arith.truncf %327 : vector<8x64xf32> to vector<8x64xbf16>
    %cst_66 = arith.constant dense<0.000000e+00> : vector<8x256xf32>
    %332 = tpu.matmul %331, %235, %cst_66 {dimension_numbers = #tpu.dot_dimension_numbers<[1], [0], [0], [1], [0, 0, 1, 1], [], []>} : vector<8x64xbf16>, vector<64x256xbf16>, vector<8x256xf32> -> vector<8x256xf32>
    %333 = arith.addf %330, %332 : vector<8x256xf32>
    %334 = arith.mulf %333, %8 : vector<8x256xf32>
    %335 = math.tanh %334 : vector<8x256xf32>
    %336 = arith.mulf %335, %8 : vector<8x256xf32>
    %337 = arith.addf %336, %11 : vector<8x256xf32>
    %338 = vector.extract_strided_slice %337 {offsets = [0, 64], sizes = [8, 64], strides = [1, 1]} : vector<8x256xf32> to vector<8x64xf32>
    %339 = arith.mulf %338, %324 : vector<8x64xf32>
    %340 = vector.extract_strided_slice %337 {offsets = [0, 0], sizes = [8, 64], strides = [1, 1]} : vector<8x256xf32> to vector<8x64xf32>
    %341 = vector.extract_strided_slice %337 {offsets = [0, 128], sizes = [8, 64], strides = [1, 1]} : vector<8x256xf32> to vector<8x64xf32>
    %342 = arith.mulf %340, %341 : vector<8x64xf32>
    %343 = arith.addf %339, %342 : vector<8x64xf32>
    %344 = vector.extract_strided_slice %337 {offsets = [0, 192], sizes = [8, 64], strides = [1, 1]} : vector<8x256xf32> to vector<8x64xf32>
    %345 = math.tanh %343 : vector<8x64xf32>
    %346 = arith.mulf %344, %345 : vector<8x64xf32>
    %347 = vector.extract_strided_slice %234 {offsets = [48, 0], sizes = [8, 256], strides = [1, 1]} : vector<64x256xf32> to vector<8x256xf32>
    %348 = vector.extract_strided_slice %234 {offsets = [8, 0], sizes = [8, 256], strides = [1, 1]} : vector<64x256xf32> to vector<8x256xf32>
    %349 = arith.select %29, %347, %348 : vector<8x256xi1>, vector<8x256xf32>
    %350 = arith.truncf %346 : vector<8x64xf32> to vector<8x64xbf16>
    %cst_67 = arith.constant dense<0.000000e+00> : vector<8x256xf32>
    %351 = tpu.matmul %350, %235, %cst_67 {dimension_numbers = #tpu.dot_dimension_numbers<[1], [0], [0], [1], [0, 0, 1, 1], [], []>} : vector<8x64xbf16>, vector<64x256xbf16>, vector<8x256xf32> -> vector<8x256xf32>
    %352 = arith.addf %349, %351 : vector<8x256xf32>
    %353 = arith.mulf %352, %8 : vector<8x256xf32>
    %354 = math.tanh %353 : vector<8x256xf32>
    %355 = arith.mulf %354, %8 : vector<8x256xf32>
    %356 = arith.addf %355, %11 : vector<8x256xf32>
    %357 = vector.extract_strided_slice %356 {offsets = [0, 64], sizes = [8, 64], strides = [1, 1]} : vector<8x256xf32> to vector<8x64xf32>
    %358 = arith.mulf %357, %343 : vector<8x64xf32>
    %359 = vector.extract_strided_slice %356 {offsets = [0, 0], sizes = [8, 64], strides = [1, 1]} : vector<8x256xf32> to vector<8x64xf32>
    %360 = vector.extract_strided_slice %356 {offsets = [0, 128], sizes = [8, 64], strides = [1, 1]} : vector<8x256xf32> to vector<8x64xf32>
    %361 = arith.mulf %359, %360 : vector<8x64xf32>
    %362 = arith.addf %358, %361 : vector<8x64xf32>
    %363 = vector.extract_strided_slice %356 {offsets = [0, 192], sizes = [8, 64], strides = [1, 1]} : vector<8x256xf32> to vector<8x64xf32>
    %364 = math.tanh %362 : vector<8x64xf32>
    %365 = arith.mulf %363, %364 : vector<8x64xf32>
    %366 = vector.extract_strided_slice %234 {offsets = [56, 0], sizes = [8, 256], strides = [1, 1]} : vector<64x256xf32> to vector<8x256xf32>
    %367 = vector.extract_strided_slice %234 {offsets = [0, 0], sizes = [8, 256], strides = [1, 1]} : vector<64x256xf32> to vector<8x256xf32>
    %368 = arith.select %29, %366, %367 : vector<8x256xi1>, vector<8x256xf32>
    %369 = arith.truncf %365 : vector<8x64xf32> to vector<8x64xbf16>
    %cst_68 = arith.constant dense<0.000000e+00> : vector<8x256xf32>
    %370 = tpu.matmul %369, %235, %cst_68 {dimension_numbers = #tpu.dot_dimension_numbers<[1], [0], [0], [1], [0, 0, 1, 1], [], []>} : vector<8x64xbf16>, vector<64x256xbf16>, vector<8x256xf32> -> vector<8x256xf32>
    %371 = arith.addf %368, %370 : vector<8x256xf32>
    %372 = arith.mulf %371, %8 : vector<8x256xf32>
    %373 = math.tanh %372 : vector<8x256xf32>
    %374 = arith.mulf %373, %8 : vector<8x256xf32>
    %375 = arith.addf %374, %11 : vector<8x256xf32>
    %376 = vector.extract_strided_slice %375 {offsets = [0, 64], sizes = [8, 64], strides = [1, 1]} : vector<8x256xf32> to vector<8x64xf32>
    %377 = arith.mulf %376, %362 : vector<8x64xf32>
    %378 = vector.extract_strided_slice %375 {offsets = [0, 0], sizes = [8, 64], strides = [1, 1]} : vector<8x256xf32> to vector<8x64xf32>
    %379 = vector.extract_strided_slice %375 {offsets = [0, 128], sizes = [8, 64], strides = [1, 1]} : vector<8x256xf32> to vector<8x64xf32>
    %380 = arith.mulf %378, %379 : vector<8x64xf32>
    %381 = arith.addf %377, %380 : vector<8x64xf32>
    %382 = vector.extract_strided_slice %375 {offsets = [0, 192], sizes = [8, 64], strides = [1, 1]} : vector<8x256xf32> to vector<8x64xf32>
    %383 = math.tanh %381 : vector<8x64xf32>
    %384 = arith.mulf %382, %383 : vector<8x64xf32>
    %385 = arith.select %32, %384, %251 : vector<8x64xi1>, vector<8x64xf32>
    %386 = arith.truncf %385 : vector<8x64xf32> to vector<8x64xbf16>
    %c0_69 = arith.constant 0 : index
    %c0_70 = arith.constant 0 : index
    %387 = vector.load %arg9[%c0_69, %c0_70] : memref<64x128xbf16, #tpu.memory_space<vmem>>, vector<64x128xbf16>
    %cst_71 = arith.constant dense<0.000000e+00> : vector<8x128xf32>
    %388 = tpu.matmul %386, %387, %cst_71 {dimension_numbers = #tpu.dot_dimension_numbers<[1], [0], [0], [1], [0, 0, 1, 1], [], []>} : vector<8x64xbf16>, vector<64x128xbf16>, vector<8x128xf32> -> vector<8x128xf32>
    %c0_72 = arith.constant 0 : index
    %c0_73 = arith.constant 0 : index
    %389 = vector.load %arg10[%c0_72, %c0_73] : memref<1x128xf32, #tpu.memory_space<vmem>>, vector<1x128xf32>
    %390 = vector.broadcast %389 : vector<1x128xf32> to vector<8x128xf32>
    %391 = arith.addf %388, %390 : vector<8x128xf32>
    %c0_74 = arith.constant 0 : index
    %c0_75 = arith.constant 0 : index
    %392 = vector.load %arg11[%c0_74, %c0_75] : memref<8x128xf32, #tpu.memory_space<vmem>>, vector<8x128xf32>
    tpu.vector_store %arg11[%c0_74, %c0_75], %391 {strides = array<i32>} : memref<8x128xf32, #tpu.memory_space<vmem>>, vector<8x128xf32>,
    return
  }
}

</mosaic_0001>

<bundles_post_ra>
// kernel: tpu_custom_call.1
= control target key start
LH: loop header
LB: loop body
LE: loop exit
PB: predicated region body
PF: predicated region fallthrough
CT: control target
= control target key end

     0   :  { %16 = vsyncpa [#allocation4], 0  ;;  %s3163_s0 = inlined_call_operand.vmem [shape: bf16[64,16], index: 0, kind: input, shape index: {}]   ;;  %s3164_s1 = inlined_call_operand.hbm [shape: bf16[16,32], index: 1, kind: input, shape index: {}]   ;;  %s3165_s2 = inlined_call_operand.hbm [shape: f32[1,32], index: 2, kind: input, shape index: {}]   ;;  %s3166_s3 = inlined_call_operand.hbm [shape: bf16[32,256], index: 3, kind: input, shape index: {}]   ;;  %s3167_s4 = inlined_call_operand.hbm [shape: bf16[64,256], index: 4, kind: input, shape index: {}]   ;;  %s3168_s5 = inlined_call_operand.vmem [shape: f32[1,256], index: 5, kind: input, shape index: {}]   ;;  %s3169_s6 = inlined_call_operand.hbm [shape: bf16[64,256], index: 6, kind: input, shape index: {}]   ;;  %s3170_s7 = inlined_call_operand.vmem [shape: bf16[64,256], index: 7, kind: input, shape index: {}]   ;;  %s3171_s8 = inlined_call_operand.vmem [shape: f32[1,256], index: 8, kind: input, shape index: {}]   ;;  %s3172_s9 = inlined_call_operand.hbm [shape: bf16[64,128], index: 9, kind: input, shape index: {}]   ;;  %s3173_s10 = inlined_call_operand.vmem [shape: f32[1,128], index: 10, kind: input, shape index: {}]   ;;  %s3174_s11 = inlined_call_operand.hbm [shape: f32[8,128], index: 11, kind: output, shape index: {}]  }
   0x1   :  { %17 = vsyncpa [#allocation7], 0 }
   0x2   :  { %18 = vsyncpa [#allocation10], 0 }
   0x3   :  { %19 = vsyncpa [#allocation13], 0 }
   0x4   :  { %20 = vsyncpa [#allocation5], 0  ;;  %s2254_s17 = smov [#allocation6]   ;;  %s2090_s21 = scalar_lea.hbm %s3165_s2, 16 }
   0x5   :  { %s41_s18 = sshll.u32 %s2254_s17, 4  ;;  %p2091_p0 = scmp.ne.s32.totalorder %s3165_s2, %s2090_s21  ;;  %s42_s18 = int_to_ptr.vmem [resolvable:$true] %s41_s18 }
   0x6   :  { %p2094_p1 = scmp.lt.u32.totalorder %s2090_s21, %s3165_s2 }
   0x8   :  { %p2096_p2 = pnand %p2094_p1, %p2091_p0 }
   0xa   :  { %2099 = shalt.err (!%p2096_p2)
}
   0xb   :  { %s2100_s26 = scalar_lea.vmem %s42_s18, 16  ;;  %s2104_s27 = scalar_lea.vmem %s42_s18, 32 }
   0xc   :  { %p2101_p3 = scmp.ne.s32.totalorder %s42_s18, %s2100_s26  ;;  %p2105_p4 = scmp.lt.s32.totalorder %s42_s18, %s42_s18 }
   0xd   :  { %p2106_p5 = scmp.lt.s32.totalorder %s2104_s27, %s2100_s26 }
   0xf   :  { %p2107_p6 = por %p2106_p5, %p2105_p4 }
  0x11   :  { %p2108_p7 = pnand %p2107_p6, %p2101_p3 }
  0x13   :  { %2111 = shalt.err (!%p2108_p7)
}
  0x14   :  { %44 = dma.hbm_to_vmem [thread:$0]  %s3165_s2, 16, %s42_s18, [#allocation7]  }
  0x15   :  { %s2255_s30 = smov [#allocation9]   ;;  %s2256_s13 = smov [#allocation3]  }
  0x16   :  { %s62_s12 = sshll.u32 %s2255_s30, 4  ;;  %s28_s14 = sshll.u32 %s2256_s13, 4  ;;  %s63_s12 = int_to_ptr.vmem [resolvable:$true] %s62_s12  ;;  %s29_s14 = int_to_ptr.vmem [resolvable:$true] %s28_s14 }
  0x17   :  { %s2112_s17 = scalar_lea.hbm %s3167_s4, 1024 }
  0x18   :  { %p2113_p8 = scmp.ne.s32.totalorder %s3167_s4, %s2112_s17  ;;  %p2116_p9 = scmp.lt.u32.totalorder %s2112_s17, %s3167_s4 }
  0x1a   :  { %p2118_p10 = pnand %p2116_p9, %p2113_p8 }
  0x1c   :  { %2121 = shalt.err (!%p2118_p10)
}
  0x1d   :  { %s2122_s2 = scalar_lea.vmem %s63_s12, 1024  ;;  %p2127_p12 = scmp.lt.s32.totalorder %s63_s12, %s63_s12 }
  0x1e   :  { %p2123_p11 = scmp.ne.s32.totalorder %s63_s12, %s2122_s2  ;;  %p2128_p13 = scmp.lt.s32.totalorder %s2122_s2, %s2122_s2 }
  0x20   :  { %p2129_p0 = por %p2128_p13, %p2127_p12 }
  0x22   :  { %p2130_p1 = pnand %p2129_p0, %p2123_p11 }
  0x24   :  { %2133 = shalt.err (!%p2130_p1)
}
  0x25   :  { %s2257_s18 = smov 128   ;;  %s2258_s23 = smov 8  }
  0x26   :  { %68 = dma.hbm_to_vmem [thread:$0]  %s3167_s4, 1024, %s63_s12, [#allocation10], %s2257_s18, %s2257_s18, %s2258_s23  }
  0x27   :  { %s2134_s28 = scalar_lea.hbm %s3164_s1, 128 }
  0x28   :  { %p2135_p2 = scmp.ne.s32.totalorder %s3164_s1, %s2134_s28  ;;  %p2138_p3 = scmp.lt.u32.totalorder %s2134_s28, %s3164_s1 }
  0x2a   :  { %p2140_p4 = pnand %p2138_p3, %p2135_p2 }
  0x2c   :  { %2143 = shalt.err (!%p2140_p4)
}
  0x2d   :  { %s2144_s16 = scalar_lea.vmem %s29_s14, 128  ;;  %p2149_p6 = scmp.lt.s32.totalorder %s29_s14, %s29_s14 }
  0x2e   :  { %p2145_p5 = scmp.ne.s32.totalorder %s29_s14, %s2144_s16  ;;  %p2150_p7 = scmp.lt.s32.totalorder %s2144_s16, %s2144_s16 }
  0x30   :  { %p2151_p8 = por %p2150_p7, %p2149_p6 }
  0x32   :  { %p2152_p9 = pnand %p2151_p8, %p2145_p5 }
  0x34   :  { %2155 = shalt.err (!%p2152_p9)
}
  0x35   :  { %s2259_s4 = smov 64   ;;  %s2260_s12 = smov 4  }
  0x36   :  { %34 = dma.hbm_to_vmem [thread:$0]  %s3164_s1, 128, %s29_s14, [#allocation4], %s2259_s4, %s2259_s4, %s2260_s12  }
  0x37   :  { %s2261_s20 = smov [#allocation8]   ;;  %s2262_s22 = smov [#allocation11]  }
  0x38   :  { %s50_s21 = sshll.u32 %s2261_s20, 4  ;;  %s76_s2 = sshll.u32 %s2262_s22, 4  ;;  %s51_s21 = int_to_ptr.vmem [resolvable:$true] %s50_s21  ;;  %s77_s2 = int_to_ptr.vmem [resolvable:$true] %s76_s2 }
  0x39   :  { %s2156_s26 = scalar_lea.hbm %s3166_s3, 512 }
  0x3a   :  { %p2157_p10 = scmp.ne.s32.totalorder %s3166_s3, %s2156_s26  ;;  %p2160_p11 = scmp.lt.u32.totalorder %s2156_s26, %s3166_s3 }
  0x3c   :  { %p2162_p12 = pnand %p2160_p11, %p2157_p10 }
  0x3e   :  { %2165 = shalt.err (!%p2162_p12)
}
  0x3f   :  { %s2166_s1 = scalar_lea.vmem %s51_s21, 512  ;;  %p2171_p0 = scmp.lt.s32.totalorder %s51_s21, %s51_s21 }
  0x40   :  { %p2167_p13 = scmp.ne.s32.totalorder %s51_s21, %s2166_s1  ;;  %p2172_p1 = scmp.lt.s32.totalorder %s2166_s1, %s2166_s1 }
  0x42   :  { %p2173_p2 = por %p2172_p1, %p2171_p0 }
  0x44   :  { %p2174_p3 = pnand %p2173_p2, %p2167_p13 }
  0x46   :  { %2177 = shalt.err (!%p2174_p3)
}
  0x47   :  { %56 = dma.hbm_to_vmem [thread:$0]  %s3166_s3, 512, %s51_s21, [#allocation7], %s2257_s18, %s2257_s18, %s2258_s23  }
  0x48   :  { %s2178_s17 = scalar_lea.hbm %s3169_s6, 1024 }
  0x49   :  { %p2179_p4 = scmp.ne.s32.totalorder %s3169_s6, %s2178_s17  ;;  %p2182_p5 = scmp.lt.u32.totalorder %s2178_s17, %s3169_s6 }
  0x4b   :  { %p2184_p6 = pnand %p2182_p5, %p2179_p4 }
  0x4d   :  { %2187 = shalt.err (!%p2184_p6)
}
  0x4e   :  { %s2188_s25 = scalar_lea.vmem %s77_s2, 1024  ;;  %p2193_p8 = scmp.lt.s32.totalorder %s77_s2, %s77_s2 }
  0x4f   :  { %p2189_p7 = scmp.ne.s32.totalorder %s77_s2, %s2188_s25  ;;  %p2194_p9 = scmp.lt.s32.totalorder %s2188_s25, %s2188_s25 }
  0x51   :  { %p2195_p10 = por %p2194_p9, %p2193_p8 }
  0x53   :  { %p2196_p11 = pnand %p2195_p10, %p2189_p7 }
  0x55   :  { %2199 = shalt.err (!%p2196_p11)
}
  0x56   :  { %82 = dma.hbm_to_vmem [thread:$0]  %s3169_s6, 1024, %s77_s2, [#allocation10], %s2257_s18, %s2257_s18, %s2258_s23  }
  0x57   :  { %s2263_s26 = smov [#allocation12]   ;;  %s2200_s30 = scalar_lea.hbm %s3172_s9, 512 }
  0x58   :  { %s92_s27 = sshll.u32 %s2263_s26, 4  ;;  %p2201_p12 = scmp.ne.s32.totalorder %s3172_s9, %s2200_s30  ;;  %s93_s27 = int_to_ptr.vmem [resolvable:$true] %s92_s27 }
  0x59   :  { %p2204_p13 = scmp.lt.u32.totalorder %s2200_s30, %s3172_s9 }
  0x5b   :  { %p2206_p0 = pnand %p2204_p13, %p2201_p12 }
  0x5d   :  { %2209 = shalt.err (!%p2206_p0)
}
  0x5e   :  { %s2210_s16 = scalar_lea.vmem %s93_s27, 512  ;;  %p2215_p2 = scmp.lt.s32.totalorder %s93_s27, %s93_s27 }
  0x5f   :  { %p2211_p1 = scmp.ne.s32.totalorder %s93_s27, %s2210_s16  ;;  %p2216_p3 = scmp.lt.s32.totalorder %s2210_s16, %s2210_s16 }
  0x61   :  { %p2217_p4 = por %p2216_p3, %p2215_p2 }
  0x63   :  { %p2218_p5 = pnand %p2217_p4, %p2211_p1 }
  0x65   :  { %2221 = shalt.err (!%p2218_p5)
}
  0x66   :  { %98 = dma.hbm_to_vmem [thread:$0]  %s3172_s9, 512, %s93_s27, [#allocation13], %s2259_s4, %s2259_s4, %s2260_s12  }
  0x67   :  { %2244 = dma.done.wait [#allocation4], 128  }
  0x68   :  { %2245 = vsyncadd [#allocation4], 4294967168 }
  0x69   :  { %2246 = dma.done.wait [#allocation7], 528  }
  0x6a   :  { %2247 = vsyncadd [#allocation7], 4294966768 }
  0x6b   :  { %2248 = dma.done.wait [#allocation10], 2048  }
  0x6c   :  { %2249 = vsyncadd [#allocation10], 4294965248 }
  0x6d   :  { %2250 = dma.done.wait [#allocation13], 512  }
  0x6e   :  { %2251 = vsyncadd [#allocation13], 4294966784  ;;  %v1943_v0 = vld [vmem:[#allocation3] sm:$0xff]   ;;  %vm203_vm0 = vcmask 130048   ;;  %v1945_v2 = vld [vmem:[%s3163_s0 + $0x8] sm:$0xff]   ;;  %v2264_v9 = vmov 0   ;;  %v120_v31 = vlaneseq }
  0x6f   :  { %v1944_v1 = vld [vmem:[%s3163_s0] sm:$0xff]   ;;  %1901 = vmatprep.subr.bf16.mxu0 %v1943_v0  ;;  %v1946_v3 = vld [vmem:[%s3163_s0 + $0x10] sm:$0xff]   ;;  %v1947_v4 = vld [vmem:[%s3163_s0 + $0x18] sm:$0xff]   ;;  %366 = vmatprep.mubr.bf16.mxu1 %v2264_v9  ;;  %vm321_vm1 = vcmask 261120   ;;  %vm487_vm5 = vcmask 523264   ;;  %vm439_vm6 = vcmask 523520  }
  0x70   :  { %1902 = vmatpush3.bf16.msra.mxu0 %v1943_v0  ;;  %1903 = vmatprep.mubr.msk.bf16.mxu0 %vm203_vm0, %v1944_v1  ;;  %v1948_v5 = vld [vmem:[#allocation8 + $0x4] ss:$8 sps:$4 sm:$0xff]   ;;  %v1950_v6 = vld [vmem:[#allocation8] ss:$8 sps:$4 sm:$0xff]   ;;  %v1951_v7 = vld [vmem:[#allocation8 + $0x14] ss:$8 sps:$4 sm:$0xff]  }
  0x71   :  { %334 = vmatprep.subr.bf16.mxu1 %v1948_v5  ;;  %v1953_v8 = vld [vmem:[#allocation8 + $0x10] ss:$8 sps:$4 sm:$0xff]   ;;  %v1825_v11 = vld [vmem:[#allocation6] ss:$0 sm:$0xff]  ;;  %v2438_v32 = vshrl.u32 %v120_v31, 7  ;;  %v2453_v44 = vand.u32 127, %v120_v31 }
  0x72   :  { %335 = vmatpush1.bf16.msra.mxu1 %v1950_v6  ;;  %v289_v34 = vld [vmem:[%s3168_s5] sm:$0x3]  ;;  %vm2267_vm7 = vmmov 0   ;;  %s2268_s17 = smov [#allocation14]  }
  0x73   :  { %1904 = vmatmul.mubr.msk.bf16.vlgmr.msra.gmra.mrb[0].mxu0 %vm203_vm0, %v1945_v2  ;;  %336 = vmatprep.subr.bf16.mxu1 %v1951_v7  ;;  %v293_v33 = vsub.s32 0, %v2438_v32  ;;  %v297_v35 = vsub.s32 1, %v2438_v32  ;;  %v122_v46 = vadd.s32 128, %v2453_v44  ;;  %v137_v53 = vand.u32 63, %v2453_v44  ;;  %s1813_s19 = sshll.u32 %s2268_s17, 4  ;;  %s1814_s19 = int_to_ptr.vmem [resolvable:$true] %s1813_s19 }
  0x74   :  { %1907 = vmatprep.mubr.msk.bf16.mxu0 %vm203_vm0, %v1946_v3  ;;  %vm159_vm8 = vcmp.lt.s32.totalorder %v2453_v44, 32  ;;  %p2227_p7 = scmp.lt.s32.totalorder %s1814_s19, %s1814_s19 }
  0x75   :  { %v294_v37 = vrot.slane %v289_v34, %v293_v33  ;;  %v298_v39 = vrot.slane %v289_v34, %v297_v35  ;;  %v144_v55 = vand.u32 63, %v122_v46  ;;  %vm2465_vm2 = vcmp.lt.s32.totalorder %v137_v53, 32  ;;  %v2571_v53 = vld [vmem:[#allocation9 + $0x14] ss:$8 sps:$4 sm:$0xff]  }
  0x76   :  { %337 = vmatpush1.bf16.msra.mxu1 %v1953_v8  ;;  %vm126_vm4 = vcmp.lt.s32.totalorder %v122_v46, 192  ;;  %v2576_v46 = vld [vmem:[#allocation9 + $0x10] ss:$8 sps:$4 sm:$0xff]  }
  0x77   :  { %vm2469_vm3 = vcmp.lt.s32.totalorder %v144_v55, 32  ;;  %v2580_v55 = vld [vmem:[#allocation9 + $0x24] ss:$8 sps:$4 sm:$0xff]  }
  0x7b   :  { %1908 = vmatmul.mubr.msk.bf16.gmra.mrb[4].mxu0 %vm203_vm0, %v1947_v4 }
  0x7c   :  { %523 = vmatprep.mubr.bf16.mxu0 %v2264_v9 }
 0x146   :  { %v1905_v10 = vpop.f32.mrb[0].mxu0 }
 0x147   :  { %v250_v12 = vpop.f32.mrb[1].mxu0  ;;  %v259_v14 = vadd.f32 %v1905_v10, %v1825_v11 }
 0x148   :  { %v1906_v13 = vpop.f32.mrb[2].mxu0  ;;  %v251_v17 = vadd.f32 %v1825_v11, %v250_v12 }
 0x149   :  { %v262_v15 = vadd.f32 %v1906_v13, %v1825_v11  ;;  %v253_v16 = vpop.f32.mrb[3].mxu0 }
 0x14a   :  { %v254_v18 = vadd.f32 %v1825_v11, %v253_v16 }
 0x14b   :  { %v282_v19 = vpack.c.bf16 %v262_v15, %v259_v14  ;;  %v2265_v14 = vmov 0.5  }
 0x14c   :  { %v281_v20 = vpack.c.bf16 %v254_v18, %v251_v17  ;;  %v2516_v15 = vsel %vm126_vm4, 1.0, %v2265_v14 }
 0x14e   :  { %1839 = vmatmul.mubr.msk.bf16.vlgmr.msra.gmra.mrb[0].mxu1 %vm321_vm1, %v281_v20  ;;  %v1909_v21 = vpop.f32.mrb[4].mxu0 }
 0x14f   :  { %v275_v22 = vadd.f32 %v1909_v21, %v1825_v11  ;;  %v266_v23 = vpop.f32.mrb[5].mxu0  ;;  %376 = vmatprep.mubr.bf16.mxu1 %v2264_v9 }
 0x150   :  { %v267_v24 = vadd.f32 %v1825_v11, %v266_v23  ;;  %v1910_v25 = vpop.f32.mrb[6].mxu0 }
 0x151   :  { %v278_v26 = vadd.f32 %v1910_v25, %v1825_v11  ;;  %v269_v27 = vpop.f32.mrb[7].mxu0 }
 0x152   :  { %v270_v28 = vadd.f32 %v1825_v11, %v269_v27 }
 0x153   :  { %v284_v29 = vpack.c.bf16 %v278_v26, %v275_v22 }
 0x154   :  { %v283_v30 = vpack.c.bf16 %v270_v28, %v267_v24 }
 0x156   :  { %1840 = vmatmul.mubr.msk.bf16.gmra.mrb[4].mxu1 %vm321_vm1, %v282_v19 }
 0x157   :  { %386 = vmatprep.mubr.bf16.mxu1 %v2264_v9 }
 0x15e   :  { %1841 = vmatmul.mubr.msk.bf16.gmra.mrb[8].mxu1 %vm321_vm1, %v283_v30 }
 0x15f   :  { %396 = vmatprep.mubr.bf16.mxu1 %v2264_v9 }
 0x166   :  { %1842 = vmatmul.mubr.msk.bf16.gmra.mrb[12].mxu1 %vm321_vm1, %v284_v29 }
 0x167   :  { %673 = vmatprep.mubr.bf16.mxu1 %v2264_v9 }
 0x221   :  { %v368_v36 = vpop.f32.mrb[0].mxu1 }
 0x222   :  { %v370_v38 = vpop.f32.mrb[1].mxu1  ;;  %v2520_v18 = vadd.f32 %v368_v36, %v294_v37 }
 0x223   :  { %v372_v40 = vpop.f32.mrb[2].mxu1  ;;  %v2532_v23 = vadd.f32 %v370_v38, %v298_v39  ;;  %v2562_v38 = vsel %vm126_vm4, 0.0, %v2265_v14 }
 0x224   :  { %v2449_v41 = vadd.f32 %v372_v40, %v294_v37  ;;  %v374_v42 = vpop.f32.mrb[3].mxu1 }
 0x225   :  { %v2451_v43 = vadd.f32 %v374_v42, %v298_v39 }
 0x229   :  { %v378_v45 = vpop.f32.mrb[4].mxu1 }
 0x22a   :  { %v2456_v47 = vadd.f32 %v378_v45, %v294_v37  ;;  %v380_v48 = vpop.f32.mrb[5].mxu1 }
 0x22b   :  { %v2458_v49 = vadd.f32 %v380_v48, %v298_v39  ;;  %v382_v50 = vpop.f32.mrb[6].mxu1 }
 0x22c   :  { %v2460_v51 = vadd.f32 %v382_v50, %v294_v37  ;;  %v384_v52 = vpop.f32.mrb[7].mxu1  ;;  %v2567_v50 = vld [vmem:[#allocation9 + $0x4] ss:$8 sps:$4 sm:$0xff]  }
 0x22d   :  { %v2463_v54 = vadd.f32 %v384_v52, %v298_v39  ;;  %v2569_v52 = vld [vmem:[#allocation9] ss:$8 sps:$4 sm:$0xff]   ;;  %491 = vmatprep.subr.bf16.mxu0 %v2567_v50  ;;  %641 = vmatprep.subr.bf16.mxu1 %v2567_v50 }
 0x22e   :  { %492 = vmatpush1.bf16.msra.mxu0 %v2569_v52  ;;  %642 = vmatpush1.bf16.msra.mxu1 %v2569_v52 }
 0x22f   :  { %493 = vmatprep.subr.bf16.mxu0 %v2571_v53  ;;  %643 = vmatprep.subr.bf16.mxu1 %v2571_v53 }
 0x231   :  { %v388_v57 = vpop.f32.mrb[8].mxu1 }
 0x232   :  { %v2473_v59 = vadd.f32 %v388_v57, %v294_v37  ;;  %v390_v60 = vpop.f32.mrb[9].mxu1  ;;  %494 = vmatpush1.bf16.msra.mxu0 %v2576_v46  ;;  %v2584_v57 = vld [vmem:[#allocation9 + $0x20] ss:$8 sps:$4 sm:$0xff]   ;;  %644 = vmatpush1.bf16.msra.mxu1 %v2576_v46 }
 0x233   :  { %v2475_v61 = vadd.f32 %v390_v60, %v298_v39  ;;  %v392_v62 = vpop.f32.mrb[10].mxu1  ;;  %495 = vmatprep.subr.bf16.mxu0 %v2580_v55  ;;  %v2588_v60 = vld [vmem:[#allocation9 + $0x34] ss:$8 sps:$4 sm:$0xff]   ;;  %645 = vmatprep.subr.bf16.mxu1 %v2580_v55 }
 0x234   :  { %v2477_v63 = vadd.f32 %v392_v62, %v294_v37  ;;  %v394_v0 = vpop.f32.mrb[11].mxu1  ;;  %v632_v1 = vsel %vm2465_vm2, %v2460_v51, %v2473_v59  ;;  %v707_v2 = vsel %vm2465_vm2, %v2473_v59, %v2460_v51  ;;  %v2592_v62 = vld [vmem:[#allocation9 + $0x30] ss:$8 sps:$4 sm:$0xff]  }
 0x235   :  { %v2487_v3 = vadd.f32 %v394_v0, %v298_v39  ;;  %v633_v4 = vsel %vm2469_vm3, %v2463_v54, %v2475_v61  ;;  %v708_v5 = vsel %vm2469_vm3, %v2475_v61, %v2463_v54 }
 0x236   :  { %v557_v6 = vsel %vm2465_vm2, %v2456_v47, %v2477_v63  ;;  %v782_v7 = vsel %vm2465_vm2, %v2477_v63, %v2456_v47  ;;  %496 = vmatpush1.bf16.msra.mxu0 %v2584_v57  ;;  %646 = vmatpush1.bf16.msra.mxu1 %v2584_v57 }
 0x237   :  { %v558_v8 = vsel %vm2469_vm3, %v2458_v49, %v2487_v3  ;;  %v783_v10 = vsel %vm2469_vm3, %v2487_v3, %v2458_v49  ;;  %497 = vmatprep.subr.bf16.mxu0 %v2588_v60  ;;  %647 = vmatprep.subr.bf16.mxu1 %v2588_v60 }
 0x239   :  { %v398_v11 = vpop.f32.mrb[12].mxu1 }
 0x23a   :  { %v2513_v12 = vadd.f32 %v398_v11, %v294_v37  ;;  %v400_v13 = vpop.f32.mrb[13].mxu1  ;;  %498 = vmatpush1.bf16.msra.mxu0 %v2592_v62  ;;  %648 = vmatpush1.bf16.msra.mxu1 %v2592_v62 }
 0x23b   :  { %v2518_v16 = vadd.f32 %v400_v13, %v298_v39  ;;  %v402_v17 = vpop.f32.mrb[14].mxu1  ;;  %566 = vmatprep.subr.bf16.mxu0 %v2567_v50  ;;  %791 = vmatprep.subr.bf16.mxu1 %v2567_v50 }
 0x23c   :  { %v2522_v19 = vadd.f32 %v402_v17, %v294_v37  ;;  %v404_v20 = vpop.f32.mrb[15].mxu1  ;;  %v441_v21 = vsel %vm2465_vm2, %v2449_v41, %v2513_v12  ;;  %v857_v22 = vsel %vm2465_vm2, %v2513_v12, %v2449_v41 }
 0x23d   :  { %v2534_v24 = vadd.f32 %v404_v20, %v298_v39  ;;  %v442_v25 = vsel %vm2469_vm3, %v2451_v43, %v2518_v16  ;;  %v858_v26 = vsel %vm2469_vm3, %v2518_v16, %v2451_v43 }
 0x23e   :  { %v415_v27 = vsel %vm2465_vm2, %v2520_v18, %v2522_v19  ;;  %v932_v28 = vsel %vm2465_vm2, %v2522_v19, %v2520_v18 }
 0x23f   :  { %v417_v29 = vmul.f32 0.5, %v415_v27  ;;  %v416_v30 = vsel %vm2469_vm3, %v2532_v23, %v2534_v24  ;;  %v933_v31 = vsel %vm2469_vm3, %v2534_v24, %v2532_v23  ;;  %v1966_v23 = vld [vmem:[#allocation11] ss:$8 sps:$4 sm:$0xff]   ;;  %v1968_v24 = vld [vmem:[#allocation11 + $0x4] ss:$8 sps:$4 sm:$0xff]  }
 0x240   :  { %v418_v34 = vmul.f32 %v416_v30, %v2516_v15 }
 0x241   :  { %1994 = vtanh.f32 %v417_v29 }
 0x242   :  { %1996 = vtanh.f32 %v418_v34 }
 0x24b   :  { %v1995_v36 = vpop.eup %1994 }
 0x24c   :  { %v1997_v37 = vpop.eup %1996  ;;  %v421_v39 = vmul.f32 0.5, %v1995_v36 }
 0x24d   :  { %v422_v40 = vmul.f32 %v1997_v37, %v2516_v15 }
 0x24e   :  { %v423_v42 = vadd.f32 0.5, %v421_v39 }
 0x24f   :  { %v424_v45 = vadd.f32 %v422_v40, %v2562_v38 }
 0x250   :  { %v425_v0 = vmul.f32 0.0, %v423_v42 }
 0x251   :  { %v426_v48 = vmul.f32 %v424_v45, %v423_v42 }
 0x253   :  { %428 = vrot.lane.b32.xlu0 %v426_v48, %s2259_s4 }
 0x2c5   :  { %v429_v11 = vpop.permute.xlu0 %428 }
 0x2c6   :  { %v431_v13 = vadd.f32 %v429_v11, %v425_v0 }
 0x2c8   :  { %1998 = vtanh.f32 %v431_v13 }
 0x2d2   :  { %v1999_v14 = vpop.eup %1998 }
 0x2d3   :  { %v2601_v17 = vmul.f32 %v1999_v14, %v424_v45 }
 0x2d5   :  { %v443_v20 = vpack.c.bf16 %v2601_v17, %v2601_v17 }
 0x2d7   :  { %445 = vrot.lane.b32.xlu0 %v443_v20, %s2259_s4 }
 0x349   :  { %v446_v27 = vpop.permute.xlu0 %445 }
 0x34a   :  { %1851 = vmatmul.mubr.msk.bf16.vlgmr.msra.gmra.mrb[8].mxu0 %vm487_vm5, %v446_v27 }
 0x34b   :  { %567 = vmatpush1.bf16.msra.mxu0 %v2569_v52  ;;  %598 = vmatprep.mubr.bf16.mxu0 %v2264_v9 }
 0x34c   :  { %568 = vmatprep.subr.bf16.mxu0 %v2571_v53 }
 0x34f   :  { %569 = vmatpush1.bf16.msra.mxu0 %v2576_v46 }
 0x350   :  { %570 = vmatprep.subr.bf16.mxu0 %v2580_v55 }
 0x353   :  { %571 = vmatpush1.bf16.msra.mxu0 %v2584_v57 }
 0x354   :  { %572 = vmatprep.subr.bf16.mxu0 %v2588_v60 }
 0x357   :  { %573 = vmatpush1.bf16.msra.mxu0 %v2592_v62 }
 0x358   :  { %716 = vmatprep.subr.bf16.mxu0 %v2567_v50 }
 0x41d   :  { %v525_v29 = vpop.f32.mrb[8].mxu0 }
 0x41e   :  { %v532_v30 = vadd.f32 %v525_v29, %v441_v21  ;;  %v527_v34 = vpop.f32.mrb[9].mxu0 }
 0x41f   :  { %v533_v36 = vadd.f32 %v527_v34, %v442_v25  ;;  %v529_v37 = vpop.f32.mrb[10].mxu0 }
 0x420   :  { %v534_v39 = vmul.f32 0.5, %v532_v30  ;;  %v530_v40 = vpop.f32.mrb[11].mxu0 }
 0x421   :  { %v535_v42 = vmul.f32 %v533_v36, %v2516_v15 }
 0x422   :  { %2000 = vtanh.f32 %v534_v39 }
 0x423   :  { %2002 = vtanh.f32 %v535_v42 }
 0x42c   :  { %v2001_v45 = vpop.eup %2000 }
 0x42d   :  { %v2003_v48 = vpop.eup %2002  ;;  %v538_v0 = vmul.f32 0.5, %v2001_v45 }
 0x42e   :  { %v539_v11 = vmul.f32 %v2003_v48, %v2516_v15 }
 0x42f   :  { %v540_v21 = vadd.f32 0.5, %v538_v0 }
 0x430   :  { %v541_v14 = vadd.f32 %v539_v11, %v2562_v38 }
 0x431   :  { %v542_v27 = vmul.f32 %v540_v21, %v431_v13 }
 0x432   :  { %v543_v20 = vmul.f32 %v541_v14, %v540_v21 }
 0x434   :  { %545 = vrot.lane.b32.xlu1 %v543_v20, %s2259_s4 }
 0x4a6   :  { %v546_v25 = vpop.permute.xlu1 %545 }
 0x4a7   :  { %v548_v29 = vadd.f32 %v546_v25, %v542_v27 }
 0x4a9   :  { %2004 = vtanh.f32 %v548_v29 }
 0x4b3   :  { %v2005_v30 = vpop.eup %2004 }
 0x4b4   :  { %v2630_v34 = vmul.f32 %v2005_v30, %v541_v14 }
 0x4b6   :  { %v559_v36 = vpack.c.bf16 %v2630_v34, %v2630_v34 }
 0x4b8   :  { %561 = vrot.lane.b32.xlu1 %v559_v36, %s2259_s4 }
 0x52a   :  { %v562_v37 = vpop.permute.xlu1 %561 }
 0x52b   :  { %1852 = vmatmul.mubr.msk.bf16.vlgmr.msra.gmra.mrb[12].mxu0 %vm487_vm5, %v562_v37 }
 0x52c   :  { %717 = vmatpush1.bf16.msra.mxu0 %v2569_v52  ;;  %748 = vmatprep.mubr.bf16.mxu0 %v2264_v9 }
 0x52d   :  { %718 = vmatprep.subr.bf16.mxu0 %v2571_v53 }
 0x530   :  { %719 = vmatpush1.bf16.msra.mxu0 %v2576_v46 }
 0x531   :  { %720 = vmatprep.subr.bf16.mxu0 %v2580_v55 }
 0x534   :  { %721 = vmatpush1.bf16.msra.mxu0 %v2584_v57 }
 0x535   :  { %722 = vmatprep.subr.bf16.mxu0 %v2588_v60 }
 0x538   :  { %723 = vmatpush1.bf16.msra.mxu0 %v2592_v62 }
 0x539   :  { %866 = vmatprep.subr.bf16.mxu0 %v2567_v50 }
 0x5fe   :  { %v600_v13 = vpop.f32.mrb[12].mxu0 }
 0x5ff   :  { %v607_v39 = vadd.f32 %v600_v13, %v557_v6  ;;  %v602_v40 = vpop.f32.mrb[13].mxu0 }
 0x600   :  { %v608_v42 = vadd.f32 %v602_v40, %v558_v8  ;;  %v604_v45 = vpop.f32.mrb[14].mxu0 }
 0x601   :  { %v609_v48 = vmul.f32 0.5, %v607_v39  ;;  %v605_v0 = vpop.f32.mrb[15].mxu0 }
 0x602   :  { %v610_v11 = vmul.f32 %v608_v42, %v2516_v15 }
 0x603   :  { %2006 = vtanh.f32 %v609_v48 }
 0x604   :  { %2008 = vtanh.f32 %v610_v11 }
 0x60d   :  { %v2007_v21 = vpop.eup %2006 }
 0x60e   :  { %v2009_v14 = vpop.eup %2008  ;;  %v613_v20 = vmul.f32 0.5, %v2007_v21 }
 0x60f   :  { %v614_v27 = vmul.f32 %v2009_v14, %v2516_v15 }
 0x610   :  { %v615_v6 = vadd.f32 0.5, %v613_v20 }
 0x611   :  { %v616_v25 = vadd.f32 %v614_v27, %v2562_v38 }
 0x612   :  { %v617_v36 = vmul.f32 %v615_v6, %v548_v29 }
 0x613   :  { %v618_v30 = vmul.f32 %v616_v25, %v615_v6 }
 0x615   :  { %620 = vrot.lane.b32.xlu0 %v618_v30, %s2259_s4 }
 0x687   :  { %v621_v8 = vpop.permute.xlu0 %620 }
 0x688   :  { %v623_v37 = vadd.f32 %v621_v8, %v617_v36 }
 0x68a   :  { %2010 = vtanh.f32 %v623_v37 }
 0x694   :  { %v2011_v13 = vpop.eup %2010 }
 0x695   :  { %v2659_v39 = vmul.f32 %v2011_v13, %v616_v25 }
 0x697   :  { %v634_v40 = vpack.c.bf16 %v2659_v39, %v2659_v39 }
 0x699   :  { %636 = vrot.lane.b32.xlu1 %v634_v40, %s2259_s4 }
 0x70b   :  { %v637_v42 = vpop.permute.xlu1 %636 }
 0x70c   :  { %1853 = vmatmul.mubr.msk.bf16.vlgmr.msra.gmra.mrb[16].mxu1 %vm487_vm5, %v637_v42 }
 0x70d   :  { %792 = vmatpush1.bf16.msra.mxu1 %v2569_v52  ;;  %823 = vmatprep.mubr.bf16.mxu1 %v2264_v9 }
 0x70e   :  { %793 = vmatprep.subr.bf16.mxu1 %v2571_v53 }
 0x711   :  { %794 = vmatpush1.bf16.msra.mxu1 %v2576_v46 }
 0x712   :  { %795 = vmatprep.subr.bf16.mxu1 %v2580_v55 }
 0x715   :  { %796 = vmatpush1.bf16.msra.mxu1 %v2584_v57 }
 0x716   :  { %797 = vmatprep.subr.bf16.mxu1 %v2588_v60 }
 0x719   :  { %798 = vmatpush1.bf16.msra.mxu1 %v2592_v62 }
 0x71a   :  { %941 = vmatprep.subr.bf16.mxu1 %v2567_v50 }
 0x7df   :  { %v675_v29 = vpop.f32.mrb[16].mxu1 }
 0x7e0   :  { %v682_v45 = vadd.f32 %v675_v29, %v632_v1  ;;  %v677_v48 = vpop.f32.mrb[17].mxu1 }
 0x7e1   :  { %v683_v0 = vadd.f32 %v677_v48, %v633_v4  ;;  %v679_v11 = vpop.f32.mrb[18].mxu1 }
 0x7e2   :  { %v684_v21 = vmul.f32 0.5, %v682_v45  ;;  %v680_v14 = vpop.f32.mrb[19].mxu1 }
 0x7e3   :  { %v685_v20 = vmul.f32 %v683_v0, %v2516_v15 }
 0x7e4   :  { %2012 = vtanh.f32 %v684_v21 }
 0x7e5   :  { %2014 = vtanh.f32 %v685_v20 }
 0x7ee   :  { %v2013_v50 = vpop.eup %2012 }
 0x7ef   :  { %v2015_v27 = vpop.eup %2014  ;;  %v688_v6 = vmul.f32 0.5, %v2013_v50 }
 0x7f0   :  { %v689_v25 = vmul.f32 %v2015_v27, %v2516_v15 }
 0x7f1   :  { %v690_v1 = vadd.f32 0.5, %v688_v6 }
 0x7f2   :  { %v691_v30 = vadd.f32 %v689_v25, %v2562_v38 }
 0x7f3   :  { %v692_v8 = vmul.f32 %v690_v1, %v623_v37 }
 0x7f4   :  { %v693_v36 = vmul.f32 %v691_v30, %v690_v1 }
 0x7f6   :  { %695 = vrot.lane.b32.xlu0 %v693_v36, %s2259_s4 }
 0x868   :  { %v696_v4 = vpop.permute.xlu0 %695 }
 0x869   :  { %v698_v13 = vadd.f32 %v696_v4, %v692_v8 }
 0x86b   :  { %2016 = vtanh.f32 %v698_v13 }
 0x875   :  { %v2017_v40 = vpop.eup %2016 }
 0x876   :  { %v2688_v42 = vmul.f32 %v2017_v40, %v691_v30 }
 0x878   :  { %v709_v29 = vpack.c.bf16 %v2688_v42, %v2688_v42 }
 0x87a   :  { %711 = vrot.lane.b32.xlu1 %v709_v29, %s2259_s4 }
 0x8ec   :  { %v712_v45 = vpop.permute.xlu1 %711 }
 0x8ed   :  { %1854 = vmatmul.mubr.msk.bf16.vlgmr.msra.gmra.mrb[16].mxu0 %vm487_vm5, %v712_v45 }
 0x8ee   :  { %867 = vmatpush1.bf16.msra.mxu0 %v2569_v52  ;;  %898 = vmatprep.mubr.bf16.mxu0 %v2264_v9 }
 0x8ef   :  { %868 = vmatprep.subr.bf16.mxu0 %v2571_v53 }
 0x8f2   :  { %869 = vmatpush1.bf16.msra.mxu0 %v2576_v46 }
 0x8f3   :  { %870 = vmatprep.subr.bf16.mxu0 %v2580_v55 }
 0x8f6   :  { %871 = vmatpush1.bf16.msra.mxu0 %v2584_v57 }
 0x8f7   :  { %872 = vmatprep.subr.bf16.mxu0 %v2588_v60 }
 0x8fa   :  { %873 = vmatpush1.bf16.msra.mxu0 %v2592_v62 }
 0x8fb   :  { %1091 = vmatprep.subr.bf16.mxu0 %v1968_v24 }
 0x9c0   :  { %v750_v37 = vpop.f32.mrb[16].mxu0 }
 0x9c1   :  { %v757_v48 = vadd.f32 %v750_v37, %v707_v2  ;;  %v752_v0 = vpop.f32.mrb[17].mxu0 }
 0x9c2   :  { %v758_v11 = vadd.f32 %v752_v0, %v708_v5  ;;  %v754_v21 = vpop.f32.mrb[18].mxu0 }
 0x9c3   :  { %v759_v14 = vmul.f32 0.5, %v757_v48  ;;  %v755_v20 = vpop.f32.mrb[19].mxu0 }
 0x9c4   :  { %v760_v50 = vmul.f32 %v758_v11, %v2516_v15 }
 0x9c5   :  { %2018 = vtanh.f32 %v759_v14 }
 0x9c6   :  { %2020 = vtanh.f32 %v760_v50 }
 0x9cf   :  { %v2019_v27 = vpop.eup %2018 }
 0x9d0   :  { %v2021_v6 = vpop.eup %2020  ;;  %v763_v25 = vmul.f32 0.5, %v2019_v27 }
 0x9d1   :  { %v764_v51 = vmul.f32 %v2021_v6, %v2516_v15 }
 0x9d2   :  { %v765_v59 = vadd.f32 0.5, %v763_v25 }
 0x9d3   :  { %v766_v2 = vadd.f32 %v764_v51, %v2562_v38 }
 0x9d4   :  { %v767_v54 = vmul.f32 %v765_v59, %v698_v13 }
 0x9d5   :  { %v768_v1 = vmul.f32 %v766_v2, %v765_v59 }
 0x9d7   :  { %770 = vrot.lane.b32.xlu0 %v768_v1, %s2259_s4 }
 0xa49   :  { %v771_v61 = vpop.permute.xlu0 %770 }
 0xa4a   :  { %v773_v5 = vadd.f32 %v771_v61, %v767_v54 }
 0xa4c   :  { %2022 = vtanh.f32 %v773_v5 }
 0xa56   :  { %v2023_v30 = vpop.eup %2022 }
 0xa57   :  { %v2716_v36 = vmul.f32 %v2023_v30, %v766_v2 }
 0xa59   :  { %v784_v8 = vpack.c.bf16 %v2716_v36, %v2716_v36 }
 0xa5b   :  { %786 = vrot.lane.b32.xlu1 %v784_v8, %s2259_s4 }
 0xacd   :  { %v787_v4 = vpop.permute.xlu1 %786 }
 0xace   :  { %1855 = vmatmul.mubr.msk.bf16.vlgmr.msra.gmra.mrb[20].mxu1 %vm487_vm5, %v787_v4 }
 0xacf   :  { %942 = vmatpush1.bf16.msra.mxu1 %v2569_v52  ;;  %973 = vmatprep.mubr.bf16.mxu1 %v2264_v9 }
 0xad0   :  { %943 = vmatprep.subr.bf16.mxu1 %v2571_v53 }
 0xad3   :  { %944 = vmatpush1.bf16.msra.mxu1 %v2576_v46 }
 0xad4   :  { %945 = vmatprep.subr.bf16.mxu1 %v2580_v55 }
 0xad7   :  { %946 = vmatpush1.bf16.msra.mxu1 %v2584_v57 }
 0xad8   :  { %947 = vmatprep.subr.bf16.mxu1 %v2588_v60 }
 0xadb   :  { %948 = vmatpush1.bf16.msra.mxu1 %v2592_v62 }
 0xba1   :  { %v825_v13 = vpop.f32.mrb[20].mxu1 }
 0xba2   :  { %v832_v52 = vadd.f32 %v825_v13, %v782_v7  ;;  %v827_v40 = vpop.f32.mrb[21].mxu1 }
 0xba3   :  { %v833_v53 = vadd.f32 %v827_v40, %v783_v10  ;;  %v829_v46 = vpop.f32.mrb[22].mxu1 }
 0xba4   :  { %v834_v55 = vmul.f32 0.5, %v832_v52  ;;  %v830_v57 = vpop.f32.mrb[23].mxu1 }
 0xba5   :  { %v835_v60 = vmul.f32 %v833_v53, %v2516_v15 }
 0xba6   :  { %2024 = vtanh.f32 %v834_v55 }
 0xba7   :  { %2026 = vtanh.f32 %v835_v60 }
 0xbb0   :  { %v2025_v62 = vpop.eup %2024 }
 0xbb1   :  { %v2027_v29 = vpop.eup %2026  ;;  %v838_v45 = vmul.f32 0.5, %v2025_v62 }
 0xbb2   :  { %v839_v47 = vmul.f32 %v2027_v29, %v2516_v15 }
 0xbb3   :  { %v840_v63 = vadd.f32 0.5, %v838_v45 }
 0xbb4   :  { %v841_v7 = vadd.f32 %v839_v47, %v2562_v38 }
 0xbb5   :  { %v842_v49 = vmul.f32 %v840_v63, %v773_v5 }
 0xbb6   :  { %v843_v37 = vmul.f32 %v841_v7, %v840_v63  ;;  %v1969_v63 = vld [vmem:[#allocation11 + $0x10] ss:$8 sps:$4 sm:$0xff]  }
 0xbb8   :  { %845 = vrot.lane.b32.xlu0 %v843_v37, %s2259_s4 }
 0xc2a   :  { %v846_v3 = vpop.permute.xlu0 %845 }
 0xc2b   :  { %v848_v10 = vadd.f32 %v846_v3, %v842_v49  ;;  %v1972_v3 = vld [vmem:[#allocation11 + $0x20] ss:$8 sps:$4 sm:$0xff]  }
 0xc2d   :  { %2028 = vtanh.f32 %v848_v10 }
 0xc37   :  { %v2029_v48 = vpop.eup %2028 }
 0xc38   :  { %v2744_v0 = vmul.f32 %v2029_v48, %v841_v7 }
 0xc3a   :  { %v859_v11 = vpack.c.bf16 %v2744_v0, %v2744_v0 }
 0xc3c   :  { %861 = vrot.lane.b32.xlu1 %v859_v11, %s2259_s4  ;;  %v1975_v11 = vld [vmem:[#allocation11 + $0x30] ss:$8 sps:$4 sm:$0xff]  }
 0xcae   :  { %v862_v21 = vpop.permute.xlu1 %861 }
 0xcaf   :  { %1856 = vmatmul.mubr.msk.bf16.vlgmr.msra.gmra.mrb[20].mxu0 %vm487_vm5, %v862_v21 }
 0xcb0   :  { %1123 = vmatprep.mubr.bf16.mxu0 %v2264_v9  ;;  %1092 = vmatpush1.bf16.msra.mxu0 %v1966_v23 }
 0xd82   :  { %v900_v14 = vpop.f32.mrb[20].mxu0 }
 0xd83   :  { %v907_v20 = vadd.f32 %v900_v14, %v857_v22  ;;  %v902_v50 = vpop.f32.mrb[21].mxu0 }
 0xd84   :  { %v908_v27 = vadd.f32 %v902_v50, %v858_v26  ;;  %v904_v6 = vpop.f32.mrb[22].mxu0 }
 0xd85   :  { %v909_v25 = vmul.f32 0.5, %v907_v20  ;;  %v905_v51 = vpop.f32.mrb[23].mxu0 }
 0xd86   :  { %v910_v59 = vmul.f32 %v908_v27, %v2516_v15 }
 0xd87   :  { %2030 = vtanh.f32 %v909_v25 }
 0xd88   :  { %2032 = vtanh.f32 %v910_v59 }
 0xd91   :  { %v2031_v2 = vpop.eup %2030 }
 0xd92   :  { %v2033_v1 = vpop.eup %2032  ;;  %v913_v54 = vmul.f32 0.5, %v2031_v2 }
 0xd93   :  { %v914_v41 = vmul.f32 %v2033_v1, %v2516_v15 }
 0xd94   :  { %v915_v12 = vadd.f32 0.5, %v913_v54 }
 0xd95   :  { %v916_v22 = vadd.f32 %v914_v41, %v2562_v38 }
 0xd96   :  { %v917_v43 = vmul.f32 %v915_v12, %v848_v10  ;;  %v1974_v10 = vld [vmem:[#allocation11 + $0x24] ss:$8 sps:$4 sm:$0xff]  }
 0xd97   :  { %v918_v61 = vmul.f32 %v916_v22, %v915_v12 }
 0xd99   :  { %920 = vrot.lane.b32.xlu0 %v918_v61, %s2259_s4 }
 0xe0b   :  { %v921_v16 = vpop.permute.xlu0 %920 }
 0xe0c   :  { %v923_v26 = vadd.f32 %v921_v16, %v917_v43  ;;  %v1027_v43 = vld [vmem:[%s3171_s8] sm:$0x3] }
 0xe0e   :  { %2034 = vtanh.f32 %v923_v26 }
 0xe18   :  { %v2035_v5 = vpop.eup %2034 }
 0xe19   :  { %v925_v30 = vmul.f32 %v2035_v5, %v916_v22 }
 0xe1b   :  { %v934_v8 = vpack.c.bf16 %v925_v30, %v925_v30 }
 0xe1d   :  { %936 = vrot.lane.b32.xlu1 %v934_v8, %s2259_s4 }
 0xe21   :  { %435 = vrot.lane.b32.xlu1 %v2601_v17, %s2259_s4 }
 0xe25   :  { %927 = vrot.lane.b32.xlu1 %v925_v30, %s2259_s4  ;;  %v1036_v30 = vrot.slane %v1027_v43, %v297_v35 }
 0xe29   :  { %627 = vrot.lane.b32.xlu1 %v2659_v39, %s2259_s4 }
 0xe2d   :  { %777 = vrot.lane.b32.xlu1 %v2716_v36, %s2259_s4 }
 0xe8f   :  { %v937_v4 = vpop.permute.xlu1 %936 }
 0xe90   :  { %1857 = vmatmul.mubr.msk.bf16.vlgmr.msra.gmra.mrb[24].mxu1 %vm487_vm5, %v937_v4 }
 0xe91   :  { %1272 = vmatprep.mubr.bf16.mxu1 %v2264_v9 }
 0xe93   :  { %v436_v13 = vpop.permute.xlu1 %435 }
 0xe94   :  { %438 = vst.msk [vmem:[#allocation2] sm:$0xff] %vm321_vm1, %v436_v13 }
 0xe95   :  { %440 = vst.msk [vmem:[#allocation2 + $0x38] sm:$0xff] %vm439_vm6, %v436_v13 }
 0xe97   :  { %v928_v17 = vpop.permute.xlu1 %927 }
 0xe9b   :  { %v628_v52 = vpop.permute.xlu1 %627 }
 0xe9c   :  { %630 = vst.msk [vmem:[#allocation2 + $0x10] sm:$0xff] %vm321_vm1, %v628_v52 }
 0xe9d   :  { %631 = vst.msk [vmem:[#allocation2 + $0x28] sm:$0xff] %vm439_vm6, %v628_v52 }
 0xe9f   :  { %v778_v27 = vpop.permute.xlu1 %777 }
 0xf63   :  { %v975_v39 = vpop.f32.mrb[24].mxu1 }
 0xf64   :  { %v982_v36 = vadd.f32 %v975_v39, %v932_v28  ;;  %v977_v40 = vpop.f32.mrb[25].mxu1 }
 0xf65   :  { %v983_v53 = vadd.f32 %v977_v40, %v933_v31  ;;  %v979_v46 = vpop.f32.mrb[26].mxu1  ;;  %v1971_v31 = vld [vmem:[#allocation11 + $0x14] ss:$8 sps:$4 sm:$0xff]  }
 0xf66   :  { %v984_v55 = vmul.f32 0.5, %v982_v36  ;;  %v980_v57 = vpop.f32.mrb[27].mxu1  ;;  %1093 = vmatprep.subr.bf16.mxu0 %v1971_v31 }
 0xf67   :  { %v985_v60 = vmul.f32 %v983_v53, %v2516_v15  ;;  %1094 = vmatpush1.bf16.msra.mxu0 %v1969_v63 }
 0xf68   :  { %2036 = vtanh.f32 %v984_v55  ;;  %1095 = vmatprep.subr.bf16.mxu0 %v1974_v10 }
 0xf69   :  { %2038 = vtanh.f32 %v985_v60 }
 0xf6b   :  { %1096 = vmatpush1.bf16.msra.mxu0 %v1972_v3 }
 0xf72   :  { %v2037_v62 = vpop.eup %2036 }
 0xf73   :  { %v2039_v29 = vpop.eup %2038  ;;  %v988_v45 = vmul.f32 0.5, %v2037_v62 }
 0xf74   :  { %v989_v18 = vmul.f32 %v2039_v29, %v2516_v15 }
 0xf75   :  { %v990_v19 = vadd.f32 0.5, %v988_v45 }
 0xf76   :  { %v991_v28 = vadd.f32 %v989_v18, %v2562_v38 }
 0xf77   :  { %v992_v7 = vmul.f32 %v990_v19, %v923_v26  ;;  %v1032_v26 = vrot.slane %v1027_v43, %v293_v33 }
 0xf78   :  { %v993_v47 = vmul.f32 %v991_v28, %v990_v19 }
 0xf7a   :  { %995 = vrot.lane.b32.xlu0 %v993_v47, %s2259_s4 }
 0xf7e   :  { %552 = vrot.lane.b32.xlu0 %v2630_v34, %s2259_s4  ;;  %v1977_v34 = vld [vmem:[#allocation11 + $0x34] ss:$8 sps:$4 sm:$0xff]  }
 0xf7f   :  { %1097 = vmatprep.subr.bf16.mxu0 %v1977_v34 }
 0xf80   :  { %1098 = vmatpush1.bf16.msra.mxu0 %v1975_v11 }
 0xfec   :  { %v996_v37 = vpop.permute.xlu0 %995 }
 0xfed   :  { %v998_v49 = vadd.f32 %v996_v37, %v992_v7 }
 0xfef   :  { %2040 = vtanh.f32 %v998_v49 }
 0xff0   :  { %v553_v48 = vpop.permute.xlu0 %552 }
 0xff1   :  { %555 = vst.msk [vmem:[#allocation2 + $0x8] sm:$0xff] %vm321_vm1, %v553_v48 }
 0xff2   :  { %556 = vst.msk [vmem:[#allocation2 + $0x30] sm:$0xff] %vm439_vm6, %v553_v48  ;;  %931 = vst.msk [vmem:[#allocation2 + $0x8] sm:$0xff] %vm439_vm6, %v928_v17 }
 0xff3   :  { %930 = vst.msk [vmem:[#allocation2 + $0x30] sm:$0xff] %vm321_vm1, %v928_v17 }
 0xff9   :  { %v2041_v21 = vpop.eup %2040  ;;  %v1008_v25 = vld [vmem:[#allocation2 + $0x8] sm:$0xff] }
 0xffa   :  { %v1000_v14 = vmul.f32 %v2041_v21, %v991_v28  ;;  %v1013_v22 = vld [vmem:[#allocation2 + $0x30] sm:$0xff] }
 0xffc   :  { %1002 = vrot.lane.b32.xlu0 %v1000_v14, %s2259_s4 }
0x1000   :  { %702 = vrot.lane.b32.xlu0 %v2688_v42, %s2259_s4 }
0x1004   :  { %852 = vrot.lane.b32.xlu0 %v2744_v0, %s2259_s4 }
0x106e   :  { %v1003_v20 = vpop.permute.xlu0 %1002 }
0x106f   :  { %1005 = vst.msk [vmem:[#allocation2 + $0x38] sm:$0xff] %vm321_vm1, %v1003_v20 }
0x1070   :  { %1006 = vst.msk [vmem:[#allocation2] sm:$0xff] %vm439_vm6, %v1003_v20 }
0x1072   :  { %v703_v50 = vpop.permute.xlu0 %702 }
0x1073   :  { %705 = vst.msk [vmem:[#allocation2 + $0x18] sm:$0xff] %vm321_vm1, %v703_v50 }
0x1074   :  { %706 = vst.msk [vmem:[#allocation2 + $0x20] sm:$0xff] %vm439_vm6, %v703_v50  ;;  %781 = vst.msk [vmem:[#allocation2 + $0x18] sm:$0xff] %vm439_vm6, %v778_v27 }
0x1075   :  { %780 = vst.msk [vmem:[#allocation2 + $0x20] sm:$0xff] %vm321_vm1, %v778_v27 }
0x1076   :  { %v853_v6 = vpop.permute.xlu0 %852  ;;  %v1014_v12 = vld [vmem:[#allocation2 + $0x38] sm:$0xff] }
0x1077   :  { %v1007_v42 = vld [vmem:[#allocation2] sm:$0xff]  ;;  %855 = vst.msk [vmem:[#allocation2 + $0x28] sm:$0xff] %vm321_vm1, %v853_v6  ;;  %v1018_v61 = vpack.c.bf16 %v1014_v12, %v1013_v22 }
0x1078   :  { %856 = vst.msk [vmem:[#allocation2 + $0x10] sm:$0xff] %vm439_vm6, %v853_v6  ;;  %v1015_v0 = vpack.c.bf16 %v1008_v25, %v1007_v42 }
0x107a   :  { %1866 = vmatmul.mubr.msk.bf16.vlgmr.msra.gmra.mrb[24].mxu0 %vm487_vm5, %v1015_v0 }
0x107b   :  { %1133 = vmatprep.mubr.bf16.mxu0 %v2264_v9  ;;  %v1010_v59 = vld [vmem:[#allocation2 + $0x18] sm:$0xff] }
0x107c   :  { %v1011_v54 = vld [vmem:[#allocation2 + $0x20] sm:$0xff] }
0x107e   :  { %v1012_v1 = vld [vmem:[#allocation2 + $0x28] sm:$0xff] }
0x107f   :  { %v1009_v51 = vld [vmem:[#allocation2 + $0x10] sm:$0xff]  ;;  %v1017_v41 = vpack.c.bf16 %v1012_v1, %v1011_v54 }
0x1080   :  { %v1016_v2 = vpack.c.bf16 %v1010_v59, %v1009_v51 }
0x1082   :  { %1867 = vmatmul.mubr.msk.bf16.gmra.mrb[28].mxu0 %vm487_vm5, %v1016_v2 }
0x1083   :  { %1143 = vmatprep.mubr.bf16.mxu0 %v2264_v9 }
0x108a   :  { %1868 = vmatmul.mubr.msk.bf16.gmra.mrb[32].mxu0 %vm487_vm5, %v1017_v41 }
0x108b   :  { %1153 = vmatprep.mubr.bf16.mxu0 %v2264_v9 }
0x1092   :  { %1869 = vmatmul.mubr.msk.bf16.gmra.mrb[36].mxu0 %vm487_vm5, %v1018_v61 }
0x1093   :  { %1410 = vmatprep.mubr.bf16.mxu0 %v2264_v9 }
0x114d   :  { %v1125_v16 = vpop.f32.mrb[24].mxu0 }
0x114e   :  { %v1127_v5 = vpop.f32.mrb[25].mxu0  ;;  %v2883_v34 = vadd.f32 %v1125_v16, %v1032_v26 }
0x114f   :  { %v1129_v8 = vpop.f32.mrb[26].mxu0  ;;  %v2895_v50 = vadd.f32 %v1127_v5, %v1036_v30  ;;  %v2935_v5 = vld [vmem:[%s3170_s7] ss:$8 sps:$4 sm:$0xff]  }
0x1150   :  { %v2827_v4 = vadd.f32 %v1129_v8, %v1032_v26  ;;  %v1131_v13 = vpop.f32.mrb[27].mxu0  ;;  %v2948_v8 = vld [vmem:[%s3170_s7 + $0x10] ss:$8 sps:$4 sm:$0xff]  }
0x1151   :  { %v2829_v17 = vadd.f32 %v1131_v13, %v1036_v30  ;;  %v2955_v13 = vld [vmem:[%s3170_s7 + $0x24] ss:$8 sps:$4 sm:$0xff]  }
0x1155   :  { %v1135_v52 = vpop.f32.mrb[28].mxu0 }
0x1156   :  { %v2831_v39 = vadd.f32 %v1135_v52, %v1032_v26  ;;  %v1137_v36 = vpop.f32.mrb[29].mxu0  ;;  %v2962_v52 = vld [vmem:[%s3170_s7 + $0x20] ss:$8 sps:$4 sm:$0xff]  }
0x1157   :  { %v2833_v40 = vadd.f32 %v1137_v36, %v1036_v30  ;;  %v1139_v53 = vpop.f32.mrb[30].mxu0  ;;  %v2969_v36 = vld [vmem:[%s3170_s7 + $0x34] ss:$8 sps:$4 sm:$0xff]  }
0x1158   :  { %v2835_v46 = vadd.f32 %v1139_v53, %v1032_v26  ;;  %v1141_v33 = vpop.f32.mrb[31].mxu0  ;;  %v2976_v53 = vld [vmem:[%s3170_s7 + $0x30] ss:$8 sps:$4 sm:$0xff]  }
0x1159   :  { %v2837_v55 = vadd.f32 %v1141_v33, %v1036_v30 }
0x115d   :  { %v1145_v32 = vpop.f32.mrb[32].mxu0 }
0x115e   :  { %v2839_v35 = vadd.f32 %v1145_v32, %v1032_v26  ;;  %v1147_v57 = vpop.f32.mrb[33].mxu0 }
0x115f   :  { %v2841_v60 = vadd.f32 %v1147_v57, %v1036_v30  ;;  %v1149_v62 = vpop.f32.mrb[34].mxu0 }
0x1160   :  { %v2843_v29 = vadd.f32 %v1149_v62, %v1032_v26  ;;  %v1151_v45 = vpop.f32.mrb[35].mxu0  ;;  %v1369_v18 = vsel %vm2465_vm2, %v2835_v46, %v2839_v35  ;;  %v1438_v19 = vsel %vm2465_vm2, %v2839_v35, %v2835_v46 }
0x1161   :  { %v2853_v28 = vadd.f32 %v1151_v45, %v1036_v30  ;;  %v1370_v47 = vsel %vm2469_vm3, %v2837_v55, %v2841_v60  ;;  %v1439_v23 = vsel %vm2469_vm3, %v2841_v60, %v2837_v55 }
0x1162   :  { %v1300_v24 = vsel %vm2465_vm2, %v2831_v39, %v2843_v29  ;;  %v1507_v31 = vsel %vm2465_vm2, %v2843_v29, %v2831_v39 }
0x1163   :  { %v1301_v63 = vsel %vm2469_vm3, %v2833_v40, %v2853_v28  ;;  %v1508_v7 = vsel %vm2469_vm3, %v2853_v28, %v2833_v40 }
0x1165   :  { %v1155_v37 = vpop.f32.mrb[36].mxu0 }
0x1166   :  { %v2879_v49 = vadd.f32 %v1155_v37, %v1032_v26  ;;  %v1157_v3 = vpop.f32.mrb[37].mxu0 }
0x1167   :  { %v2881_v10 = vadd.f32 %v1157_v3, %v1036_v30  ;;  %v1159_v48 = vpop.f32.mrb[38].mxu0 }
0x1168   :  { %v2885_v11 = vadd.f32 %v1159_v48, %v1032_v26  ;;  %v1161_v21 = vpop.f32.mrb[39].mxu0  ;;  %v1191_v14 = vsel %vm2465_vm2, %v2827_v4, %v2879_v49  ;;  %v1576_v20 = vsel %vm2465_vm2, %v2879_v49, %v2827_v4  ;;  %v2930_v26 = vld [vmem:[%s3170_s7 + $0x4] ss:$8 sps:$4 sm:$0xff]  }
0x1169   :  { %v2897_v27 = vadd.f32 %v1161_v21, %v1036_v30  ;;  %v1192_v6 = vsel %vm2469_vm3, %v2829_v17, %v2881_v10  ;;  %v1577_v42 = vsel %vm2469_vm3, %v2881_v10, %v2829_v17  ;;  %v2940_v30 = vld [vmem:[%s3170_s7 + $0x14] ss:$8 sps:$4 sm:$0xff]   ;;  %1240 = vmatprep.subr.bf16.mxu1 %v2930_v26  ;;  %1378 = vmatprep.subr.bf16.mxu0 %v2930_v26 }
0x116a   :  { %v1172_v25 = vsel %vm2465_vm2, %v2883_v34, %v2885_v11  ;;  %v1645_v0 = vsel %vm2465_vm2, %v2885_v11, %v2883_v34  ;;  %1241 = vmatpush1.bf16.msra.mxu1 %v2935_v5  ;;  %1379 = vmatpush1.bf16.msra.mxu0 %v2935_v5 }
0x116b   :  { %v1174_v51 = vmul.f32 0.5, %v1172_v25  ;;  %v1173_v59 = vsel %vm2469_vm3, %v2895_v50, %v2897_v27  ;;  %v1646_v2 = vsel %vm2469_vm3, %v2897_v27, %v2895_v50  ;;  %1242 = vmatprep.subr.bf16.mxu1 %v2940_v30  ;;  %1380 = vmatprep.subr.bf16.mxu0 %v2940_v30  ;;  %v1990_v50 = vld [vmem:[#allocation12] sm:$0xff]   ;;  %v2266_v27 = vmov 0.0  }
0x116c   :  { %v1175_v1 = vmul.f32 %v1173_v59, %v2516_v15 }
0x116d   :  { %2042 = vtanh.f32 %v1174_v51 }
0x116e   :  { %2044 = vtanh.f32 %v1175_v1  ;;  %1243 = vmatpush1.bf16.msra.mxu1 %v2948_v8  ;;  %1381 = vmatpush1.bf16.msra.mxu0 %v2948_v8 }
0x116f   :  { %1244 = vmatprep.subr.bf16.mxu1 %v2955_v13  ;;  %1382 = vmatprep.subr.bf16.mxu0 %v2955_v13 }
0x1172   :  { %1245 = vmatpush1.bf16.msra.mxu1 %v2962_v52  ;;  %1383 = vmatpush1.bf16.msra.mxu0 %v2962_v52 }
0x1173   :  { %1246 = vmatprep.subr.bf16.mxu1 %v2969_v36  ;;  %1384 = vmatprep.subr.bf16.mxu0 %v2969_v36 }
0x1176   :  { %1247 = vmatpush1.bf16.msra.mxu1 %v2976_v53  ;;  %1385 = vmatpush1.bf16.msra.mxu0 %v2976_v53 }
0x1177   :  { %v2043_v54 = vpop.eup %2042  ;;  %1309 = vmatprep.subr.bf16.mxu1 %v2930_v26  ;;  %1516 = vmatprep.subr.bf16.mxu0 %v2930_v26 }
0x1178   :  { %v2045_v41 = vpop.eup %2044  ;;  %v1178_v12 = vmul.f32 0.5, %v2043_v54 }
0x1179   :  { %v1179_v22 = vmul.f32 %v2045_v41, %v2516_v15 }
0x117a   :  { %v1180_v61 = vadd.f32 0.5, %v1178_v12 }
0x117b   :  { %v1181_v43 = vadd.f32 %v1179_v22, %v2562_v38 }
0x117c   :  { %v1182_v33 = vmul.f32 0.0, %v1180_v61 }
0x117d   :  { %v1183_v16 = vmul.f32 %v1181_v43, %v1180_v61 }
0x117f   :  { %1185 = vrot.lane.b32.xlu1 %v1183_v16, %s2259_s4 }
0x11f1   :  { %v1186_v32 = vpop.permute.xlu1 %1185 }
0x11f2   :  { %v1188_v57 = vadd.f32 %v1186_v32, %v1182_v33 }
0x11f4   :  { %2046 = vtanh.f32 %v1188_v57 }
0x11fe   :  { %v2047_v62 = vpop.eup %2046 }
0x11ff   :  { %v2985_v45 = vmul.f32 %v2047_v62, %v1181_v43 }
0x1201   :  { %v1193_v37 = vpack.c.bf16 %v2985_v45, %v2985_v45 }
0x1203   :  { %1195 = vrot.lane.b32.xlu0 %v1193_v37, %s2259_s4 }
0x1275   :  { %v1196_v3 = vpop.permute.xlu0 %1195 }
0x1276   :  { %1878 = vmatmul.mubr.msk.bf16.vlgmr.msra.gmra.mrb[28].mxu1 %vm487_vm5, %v1196_v3 }
0x1277   :  { %1310 = vmatpush1.bf16.msra.mxu1 %v2935_v5  ;;  %1341 = vmatprep.mubr.bf16.mxu1 %v2264_v9 }
0x1278   :  { %1311 = vmatprep.subr.bf16.mxu1 %v2940_v30 }
0x127b   :  { %1312 = vmatpush1.bf16.msra.mxu1 %v2948_v8 }
0x127c   :  { %1313 = vmatprep.subr.bf16.mxu1 %v2955_v13 }
0x127f   :  { %1314 = vmatpush1.bf16.msra.mxu1 %v2962_v52 }
0x1280   :  { %1315 = vmatprep.subr.bf16.mxu1 %v2969_v36 }
0x1283   :  { %1316 = vmatpush1.bf16.msra.mxu1 %v2976_v53 }
0x1284   :  { %1447 = vmatprep.subr.bf16.mxu1 %v2930_v26 }
0x1349   :  { %v1274_v48 = vpop.f32.mrb[28].mxu1 }
0x134a   :  { %v1281_v21 = vadd.f32 %v1274_v48, %v1191_v14  ;;  %v1276_v25 = vpop.f32.mrb[29].mxu1 }
0x134b   :  { %v1282_v51 = vadd.f32 %v1276_v25, %v1192_v6  ;;  %v1278_v59 = vpop.f32.mrb[30].mxu1 }
0x134c   :  { %v1283_v1 = vmul.f32 0.5, %v1281_v21  ;;  %v1279_v54 = vpop.f32.mrb[31].mxu1 }
0x134d   :  { %v1284_v41 = vmul.f32 %v1282_v51, %v2516_v15 }
0x134e   :  { %2048 = vtanh.f32 %v1283_v1 }
0x134f   :  { %2050 = vtanh.f32 %v1284_v41 }
0x1358   :  { %v2049_v12 = vpop.eup %2048 }
0x1359   :  { %v2051_v22 = vpop.eup %2050  ;;  %v1287_v61 = vmul.f32 0.5, %v2049_v12 }
0x135a   :  { %v1288_v43 = vmul.f32 %v2051_v22, %v2516_v15 }
0x135b   :  { %v1289_v14 = vadd.f32 0.5, %v1287_v61 }
0x135c   :  { %v1290_v16 = vadd.f32 %v1288_v43, %v2562_v38 }
0x135d   :  { %v1291_v32 = vmul.f32 %v1289_v14, %v1188_v57 }
0x135e   :  { %v1292_v33 = vmul.f32 %v1290_v16, %v1289_v14 }
0x1360   :  { %1294 = vrot.lane.b32.xlu1 %v1292_v33, %s2259_s4 }
0x13d2   :  { %v1295_v6 = vpop.permute.xlu1 %1294 }
0x13d3   :  { %v1297_v62 = vadd.f32 %v1295_v6, %v1291_v32 }
0x13d5   :  { %2052 = vtanh.f32 %v1297_v62 }
0x13df   :  { %v2053_v37 = vpop.eup %2052 }
0x13e0   :  { %v1299_v3 = vmul.f32 %v2053_v37, %v1290_v16 }
0x13e2   :  { %v1302_v48 = vpack.c.bf16 %v1299_v3, %v1299_v3 }
0x13e4   :  { %1304 = vrot.lane.b32.xlu0 %v1302_v48, %s2259_s4 }
0x1456   :  { %v1305_v21 = vpop.permute.xlu0 %1304 }
0x1457   :  { %1879 = vmatmul.mubr.msk.bf16.vlgmr.msra.gmra.mrb[32].mxu1 %vm487_vm5, %v1305_v21 }
0x1458   :  { %1448 = vmatpush1.bf16.msra.mxu1 %v2935_v5  ;;  %1479 = vmatprep.mubr.bf16.mxu1 %v2264_v9 }
0x1459   :  { %1449 = vmatprep.subr.bf16.mxu1 %v2940_v30 }
0x145c   :  { %1450 = vmatpush1.bf16.msra.mxu1 %v2948_v8 }
0x145d   :  { %1451 = vmatprep.subr.bf16.mxu1 %v2955_v13 }
0x1460   :  { %1452 = vmatpush1.bf16.msra.mxu1 %v2962_v52 }
0x1461   :  { %1453 = vmatprep.subr.bf16.mxu1 %v2969_v36 }
0x1464   :  { %1454 = vmatpush1.bf16.msra.mxu1 %v2976_v53 }
0x1465   :  { %1585 = vmatprep.subr.bf16.mxu1 %v2930_v26 }
0x152a   :  { %v1343_v57 = vpop.f32.mrb[32].mxu1 }
0x152b   :  { %v1350_v25 = vadd.f32 %v1343_v57, %v1300_v24  ;;  %v1345_v51 = vpop.f32.mrb[33].mxu1 }
0x152c   :  { %v1351_v59 = vadd.f32 %v1345_v51, %v1301_v63  ;;  %v1347_v1 = vpop.f32.mrb[34].mxu1 }
0x152d   :  { %v1352_v54 = vmul.f32 0.5, %v1350_v25  ;;  %v1348_v41 = vpop.f32.mrb[35].mxu1 }
0x152e   :  { %v1353_v12 = vmul.f32 %v1351_v59, %v2516_v15 }
0x152f   :  { %2054 = vtanh.f32 %v1352_v54 }
0x1530   :  { %2056 = vtanh.f32 %v1353_v12 }
0x1539   :  { %v2055_v22 = vpop.eup %2054 }
0x153a   :  { %v2057_v61 = vpop.eup %2056  ;;  %v1356_v43 = vmul.f32 0.5, %v2055_v22 }
0x153b   :  { %v1357_v14 = vmul.f32 %v2057_v61, %v2516_v15 }
0x153c   :  { %v1358_v24 = vadd.f32 0.5, %v1356_v43 }
0x153d   :  { %v1359_v16 = vadd.f32 %v1357_v14, %v2562_v38 }
0x153e   :  { %v1360_v32 = vmul.f32 %v1358_v24, %v1297_v62 }
0x153f   :  { %v1361_v33 = vmul.f32 %v1359_v16, %v1358_v24 }
0x1541   :  { %1363 = vrot.lane.b32.xlu1 %v1361_v33, %s2259_s4 }
0x15b3   :  { %v1364_v63 = vpop.permute.xlu1 %1363 }
0x15b4   :  { %v1366_v6 = vadd.f32 %v1364_v63, %v1360_v32 }
0x15b6   :  { %2058 = vtanh.f32 %v1366_v6 }
0x15c0   :  { %v2059_v37 = vpop.eup %2058 }
0x15c1   :  { %v1368_v3 = vmul.f32 %v2059_v37, %v1359_v16 }
0x15c3   :  { %v1371_v48 = vpack.c.bf16 %v1368_v3, %v1368_v3 }
0x15c5   :  { %1373 = vrot.lane.b32.xlu0 %v1371_v48, %s2259_s4 }
0x1637   :  { %v1374_v21 = vpop.permute.xlu0 %1373 }
0x1638   :  { %1880 = vmatmul.mubr.msk.bf16.vlgmr.msra.gmra.mrb[40].mxu0 %vm487_vm5, %v1374_v21 }
0x1639   :  { %1517 = vmatpush1.bf16.msra.mxu0 %v2935_v5  ;;  %1548 = vmatprep.mubr.bf16.mxu0 %v2264_v9 }
0x163a   :  { %1518 = vmatprep.subr.bf16.mxu0 %v2940_v30 }
0x163d   :  { %1519 = vmatpush1.bf16.msra.mxu0 %v2948_v8 }
0x163e   :  { %1520 = vmatprep.subr.bf16.mxu0 %v2955_v13 }
0x1641   :  { %1521 = vmatpush1.bf16.msra.mxu0 %v2962_v52 }
0x1642   :  { %1522 = vmatprep.subr.bf16.mxu0 %v2969_v36 }
0x1645   :  { %1523 = vmatpush1.bf16.msra.mxu0 %v2976_v53 }
0x1646   :  { %1654 = vmatprep.subr.bf16.mxu0 %v2930_v26 }
0x170b   :  { %v1412_v62 = vpop.f32.mrb[40].mxu0 }
0x170c   :  { %v1419_v57 = vadd.f32 %v1412_v62, %v1369_v18  ;;  %v1414_v25 = vpop.f32.mrb[41].mxu0 }
0x170d   :  { %v1420_v51 = vadd.f32 %v1414_v25, %v1370_v47  ;;  %v1416_v59 = vpop.f32.mrb[42].mxu0 }
0x170e   :  { %v1421_v1 = vmul.f32 0.5, %v1419_v57  ;;  %v1417_v54 = vpop.f32.mrb[43].mxu0 }
0x170f   :  { %v1422_v41 = vmul.f32 %v1420_v51, %v2516_v15 }
0x1710   :  { %2060 = vtanh.f32 %v1421_v1 }
0x1711   :  { %2062 = vtanh.f32 %v1422_v41 }
0x171a   :  { %v2061_v26 = vpop.eup %2060 }
0x171b   :  { %v2063_v12 = vpop.eup %2062  ;;  %v1425_v22 = vmul.f32 0.5, %v2061_v26 }
0x171c   :  { %v1426_v61 = vmul.f32 %v2063_v12, %v2516_v15 }
0x171d   :  { %v1427_v18 = vadd.f32 0.5, %v1425_v22 }
0x171e   :  { %v1428_v43 = vadd.f32 %v1426_v61, %v2562_v38 }
0x171f   :  { %v1429_v24 = vmul.f32 %v1427_v18, %v1366_v6 }
0x1720   :  { %v1430_v14 = vmul.f32 %v1428_v43, %v1427_v18 }
0x1722   :  { %1432 = vrot.lane.b32.xlu1 %v1430_v14, %s2259_s4 }
0x1794   :  { %v1433_v47 = vpop.permute.xlu1 %1432 }
0x1795   :  { %v1435_v16 = vadd.f32 %v1433_v47, %v1429_v24 }
0x1797   :  { %2064 = vtanh.f32 %v1435_v16 }
0x17a1   :  { %v2065_v33 = vpop.eup %2064 }
0x17a2   :  { %v1437_v32 = vmul.f32 %v2065_v33, %v1428_v43 }
0x17a4   :  { %v1440_v63 = vpack.c.bf16 %v1437_v32, %v1437_v32 }
0x17a6   :  { %1442 = vrot.lane.b32.xlu0 %v1440_v63, %s2259_s4 }
0x1818   :  { %v1443_v37 = vpop.permute.xlu0 %1442 }
0x1819   :  { %1881 = vmatmul.mubr.msk.bf16.vlgmr.msra.gmra.mrb[36].mxu1 %vm487_vm5, %v1443_v37 }
0x181a   :  { %1586 = vmatpush1.bf16.msra.mxu1 %v2935_v5  ;;  %1617 = vmatprep.mubr.bf16.mxu1 %v2264_v9 }
0x181b   :  { %1587 = vmatprep.subr.bf16.mxu1 %v2940_v30 }
0x181e   :  { %1588 = vmatpush1.bf16.msra.mxu1 %v2948_v8 }
0x181f   :  { %1589 = vmatprep.subr.bf16.mxu1 %v2955_v13 }
0x1822   :  { %1590 = vmatpush1.bf16.msra.mxu1 %v2962_v52 }
0x1823   :  { %1591 = vmatprep.subr.bf16.mxu1 %v2969_v36 }
0x1826   :  { %1592 = vmatpush1.bf16.msra.mxu1 %v2976_v53 }
0x1827   :  { %1911 = vmatprep.subr.bf16.mxu1 %v2266_v27 }
0x18ec   :  { %v1481_v6 = vpop.f32.mrb[36].mxu1 }
0x18ed   :  { %v1488_v3 = vadd.f32 %v1481_v6, %v1438_v19  ;;  %v1483_v48 = vpop.f32.mrb[37].mxu1 }
0x18ee   :  { %v1489_v21 = vadd.f32 %v1483_v48, %v1439_v23  ;;  %v1485_v62 = vpop.f32.mrb[38].mxu1 }
0x18ef   :  { %v1490_v57 = vmul.f32 0.5, %v1488_v3  ;;  %v1486_v25 = vpop.f32.mrb[39].mxu1 }
0x18f0   :  { %v1491_v51 = vmul.f32 %v1489_v21, %v2516_v15 }
0x18f1   :  { %2066 = vtanh.f32 %v1490_v57 }
0x18f2   :  { %2068 = vtanh.f32 %v1491_v51 }
0x18fb   :  { %v2067_v59 = vpop.eup %2066 }
0x18fc   :  { %v2069_v1 = vpop.eup %2068  ;;  %v1494_v54 = vmul.f32 0.5, %v2067_v59 }
0x18fd   :  { %v1495_v46 = vmul.f32 %v2069_v1, %v2516_v15 }
0x18fe   :  { %v1496_v35 = vadd.f32 0.5, %v1494_v54 }
0x18ff   :  { %v1497_v19 = vadd.f32 %v1495_v46, %v2562_v38 }
0x1900   :  { %v1498_v55 = vmul.f32 %v1496_v35, %v1435_v16 }
0x1901   :  { %v1499_v41 = vmul.f32 %v1497_v19, %v1496_v35 }
0x1903   :  { %1501 = vrot.lane.b32.xlu1 %v1499_v41, %s2259_s4 }
0x1975   :  { %v1502_v60 = vpop.permute.xlu1 %1501 }
0x1976   :  { %v1504_v23 = vadd.f32 %v1502_v60, %v1498_v55 }
0x1978   :  { %2070 = vtanh.f32 %v1504_v23 }
0x1982   :  { %v2071_v26 = vpop.eup %2070 }
0x1983   :  { %v1506_v12 = vmul.f32 %v2071_v26, %v1497_v19 }
0x1985   :  { %v1509_v22 = vpack.c.bf16 %v1506_v12, %v1506_v12 }
0x1987   :  { %1511 = vrot.lane.b32.xlu0 %v1509_v22, %s2259_s4 }
0x19f9   :  { %v1512_v61 = vpop.permute.xlu0 %1511 }
0x19fa   :  { %1882 = vmatmul.mubr.msk.bf16.vlgmr.msra.gmra.mrb[44].mxu0 %vm487_vm5, %v1512_v61 }
0x19fb   :  { %1655 = vmatpush1.bf16.msra.mxu0 %v2935_v5  ;;  %1686 = vmatprep.mubr.bf16.mxu0 %v2264_v9 }
0x19fc   :  { %1656 = vmatprep.subr.bf16.mxu0 %v2940_v30 }
0x19ff   :  { %1657 = vmatpush1.bf16.msra.mxu0 %v2948_v8 }
0x1a00   :  { %1658 = vmatprep.subr.bf16.mxu0 %v2955_v13 }
0x1a03   :  { %1659 = vmatpush1.bf16.msra.mxu0 %v2962_v52 }
0x1a04   :  { %1660 = vmatprep.subr.bf16.mxu0 %v2969_v36 }
0x1a07   :  { %1661 = vmatpush1.bf16.msra.mxu0 %v2976_v53 }
0x1acd   :  { %v1550_v18 = vpop.f32.mrb[44].mxu0 }
0x1ace   :  { %v1557_v5 = vadd.f32 %v1550_v18, %v1507_v31  ;;  %v1552_v9 = vpop.f32.mrb[45].mxu0 }
0x1acf   :  { %v1558_v30 = vadd.f32 %v1552_v9, %v1508_v7  ;;  %v1554_v8 = vpop.f32.mrb[46].mxu0  ;;  %v1992_v9 = vld [vmem:[#allocation12 + $0x10] sm:$0xff]  }
0x1ad0   :  { %v1559_v13 = vmul.f32 0.5, %v1557_v5  ;;  %v1555_v52 = vpop.f32.mrb[47].mxu0 }
0x1ad1   :  { %v1560_v36 = vmul.f32 %v1558_v30, %v2516_v15 }
0x1ad2   :  { %2072 = vtanh.f32 %v1559_v13  ;;  %v1993_v13 = vld [vmem:[#allocation12 + $0x18] sm:$0xff]  }
0x1ad3   :  { %2074 = vtanh.f32 %v1560_v36 }
0x1adc   :  { %v2073_v53 = vpop.eup %2072 }
0x1add   :  { %v2075_v43 = vpop.eup %2074  ;;  %v1563_v14 = vmul.f32 0.5, %v2073_v53 }
0x1ade   :  { %v1564_v39 = vmul.f32 %v2075_v43, %v2516_v15 }
0x1adf   :  { %v1565_v29 = vadd.f32 0.5, %v1563_v14 }
0x1ae0   :  { %v1566_v31 = vadd.f32 %v1564_v39, %v2562_v38 }
0x1ae1   :  { %v1567_v40 = vmul.f32 %v1565_v29, %v1504_v23 }
0x1ae2   :  { %v1568_v24 = vmul.f32 %v1566_v31, %v1565_v29 }
0x1ae4   :  { %1570 = vrot.lane.b32.xlu1 %v1568_v24, %s2259_s4 }
0x1b56   :  { %v1571_v28 = vpop.permute.xlu1 %1570 }
0x1b57   :  { %v1573_v7 = vadd.f32 %v1571_v28, %v1567_v40 }
0x1b59   :  { %2076 = vtanh.f32 %v1573_v7 }
0x1b63   :  { %v2077_v47 = vpop.eup %2076 }
0x1b64   :  { %v1575_v16 = vmul.f32 %v2077_v47, %v1566_v31  ;;  %v1885_v31 = vld [vmem:[%s3173_s10] ss:$0 sm:$0xff] }
0x1b66   :  { %v1578_v33 = vpack.c.bf16 %v1575_v16, %v1575_v16 }
0x1b68   :  { %1580 = vrot.lane.b32.xlu0 %v1578_v33, %s2259_s4 }
0x1bda   :  { %v1581_v32 = vpop.permute.xlu0 %1580 }
0x1bdb   :  { %1883 = vmatmul.mubr.msk.bf16.vlgmr.msra.gmra.mrb[40].mxu1 %vm487_vm5, %v1581_v32 }
0x1bdc   :  { %1912 = vmatpush3.bf16.msra.mxu1 %v1990_v50  ;;  %1919 = vmatprep.mubr.msk.bf16.mxu1 %vm2267_vm7, %v2266_v27 }
0x1bdd   :  { %1913 = vmatprep.subr.bf16.mxu1 %v2266_v27 }
0x1cae   :  { %v1619_v63 = vpop.f32.mrb[40].mxu1 }
0x1caf   :  { %v1626_v37 = vadd.f32 %v1619_v63, %v1576_v20  ;;  %v1621_v6 = vpop.f32.mrb[41].mxu1 }
0x1cb0   :  { %v1627_v3 = vadd.f32 %v1621_v6, %v1577_v42  ;;  %v1623_v48 = vpop.f32.mrb[42].mxu1 }
0x1cb1   :  { %v1628_v21 = vmul.f32 0.5, %v1626_v37  ;;  %v1624_v62 = vpop.f32.mrb[43].mxu1 }
0x1cb2   :  { %v1629_v57 = vmul.f32 %v1627_v3, %v2516_v15 }
0x1cb3   :  { %2078 = vtanh.f32 %v1628_v21 }
0x1cb4   :  { %2080 = vtanh.f32 %v1629_v57 }
0x1cbd   :  { %v2079_v25 = vpop.eup %2078 }
0x1cbe   :  { %v2081_v51 = vpop.eup %2080  ;;  %v1632_v59 = vmul.f32 0.5, %v2079_v25 }
0x1cbf   :  { %v1633_v4 = vmul.f32 %v2081_v51, %v2516_v15 }
0x1cc0   :  { %v1634_v49 = vadd.f32 0.5, %v1632_v59 }
0x1cc1   :  { %v1635_v20 = vadd.f32 %v1633_v4, %v2562_v38 }
0x1cc2   :  { %v1636_v17 = vmul.f32 %v1634_v49, %v1573_v7 }
0x1cc3   :  { %v1637_v1 = vmul.f32 %v1635_v20, %v1634_v49 }
0x1cc5   :  { %1639 = vrot.lane.b32.xlu1 %v1637_v1, %s2259_s4 }
0x1d37   :  { %v1640_v10 = vpop.permute.xlu1 %1639 }
0x1d38   :  { %v1642_v42 = vadd.f32 %v1640_v10, %v1636_v17 }
0x1d3a   :  { %2082 = vtanh.f32 %v1642_v42 }
0x1d44   :  { %v2083_v54 = vpop.eup %2082 }
0x1d45   :  { %v1644_v46 = vmul.f32 %v2083_v54, %v1635_v20 }
0x1d47   :  { %v1647_v35 = vpack.c.bf16 %v1644_v46, %v1644_v46 }
0x1d49   :  { %1649 = vrot.lane.b32.xlu0 %v1647_v35, %s2259_s4 }
0x1dbb   :  { %v1650_v19 = vpop.permute.xlu0 %1649 }
0x1dbc   :  { %1884 = vmatmul.mubr.msk.bf16.vlgmr.msra.gmra.mrb[48].mxu0 %vm487_vm5, %v1650_v19 }
0x1e8f   :  { %v1688_v41 = vpop.f32.mrb[48].mxu0 }
0x1e90   :  { %v1695_v55 = vadd.f32 %v1688_v41, %v1645_v0  ;;  %v1690_v60 = vpop.f32.mrb[49].mxu0 }
0x1e91   :  { %v1696_v23 = vadd.f32 %v1690_v60, %v1646_v2  ;;  %v1692_v26 = vpop.f32.mrb[50].mxu0  ;;  %v1991_v2 = vld [vmem:[#allocation12 + $0x8] sm:$0xff]  }
0x1e92   :  { %v1697_v12 = vmul.f32 0.5, %v1695_v55  ;;  %v1693_v22 = vpop.f32.mrb[51].mxu0  ;;  %1914 = vmatpush3.bf16.msra.mxu1 %v1991_v2 }
0x1e93   :  { %v1698_v61 = vmul.f32 %v1696_v23, %v2516_v15  ;;  %1915 = vmatprep.subr.bf16.mxu1 %v2266_v27 }
0x1e94   :  { %2084 = vtanh.f32 %v1697_v12 }
0x1e95   :  { %2086 = vtanh.f32 %v1698_v61 }
0x1e96   :  { %1916 = vmatpush3.bf16.msra.mxu1 %v1992_v9 }
0x1e97   :  { %1917 = vmatprep.subr.bf16.mxu1 %v2266_v27 }
0x1e9a   :  { %1918 = vmatpush3.bf16.msra.mxu1 %v1993_v13 }
0x1e9e   :  { %v2085_v18 = vpop.eup %2084 }
0x1e9f   :  { %v2087_v56 = vpop.eup %2086  ;;  %v1701_v5 = vmul.f32 0.5, %v2085_v18 }
0x1ea0   :  { %v1702_v34 = vmul.f32 %v2087_v56, %v2516_v15 }
0x1ea1   :  { %v1703_v11 = vadd.f32 0.5, %v1701_v5 }
0x1ea2   :  { %v1704_v0 = vadd.f32 %v1702_v34, %v2562_v38 }
0x1ea3   :  { %v1705_v30 = vmul.f32 %v1703_v11, %v1642_v42 }
0x1ea4   :  { %v1706_v58 = vmul.f32 %v1704_v0, %v1703_v11 }
0x1ea6   :  { %1708 = vrot.lane.b32.xlu1 %v1706_v58, %s2259_s4 }
0x1f18   :  { %v1709_v8 = vpop.permute.xlu1 %1708 }
0x1f19   :  { %v1711_v15 = vadd.f32 %v1709_v8, %v1705_v30 }
0x1f1b   :  { %2088 = vtanh.f32 %v1711_v15 }
0x1f25   :  { %v2089_v38 = vpop.eup %2088 }
0x1f26   :  { %v1713_v52 = vmul.f32 %v2089_v38, %v1704_v0 }
0x1f28   :  { %v1938_v36 = vpack.i.bf16 %v2985_v45, %v1713_v52 }
0x1f2a   :  { %1939 = vrot.lane.b32.xlu0 %v1938_v36, %s2259_s4  ;;  %s2222_s4 = scalar_lea.vmem %s1814_s19, 128 }
0x1f2b   :  { %p2223_p6 = scmp.ne.s32.totalorder %s1814_s19, %s2222_s4  ;;  %p2228_p8 = scmp.lt.s32.totalorder %s2222_s4, %s2222_s4 }
0x1f2d   :  { %p2229_p9 = por %p2228_p8, %p2227_p7 }
0x1f2f   :  { %p2230_p10 = pnand %p2229_p9, %p2223_p6 }
0x1f9c   :  { %v1940_v53 = vpop.permute.xlu0 %1939 }
0x1f9d   :  { %v1942_v43 = vunpack.i.h.bf16 %v1940_v53  ;;  %v1941_v14 = vunpack.i.l.bf16 %v1940_v53 }
0x1f9f   :  { %v1722_v39 = vsel %vm159_vm8, %v1941_v14, %v1942_v43 }
0x1fa0   :  { %v1723_v29 = vpack.c.bf16 %v1722_v39, %v1722_v39 }
0x1fa2   :  { %1920 = vmatmul.mubr.msk.bf16.vlgmr.msra.gmra.mrb[44].mxu1 %vm487_vm5, %v1723_v29 }
0x2075   :  { %v1800_v24 = vpop.f32.mrb[44].mxu1 }
0x2076   :  { %v1801_v40 = vadd.f32 %v1885_v31, %v1800_v24  ;;  %v1921_v45 = vpop.f32.mrb[45].mxu1 }
0x2077   :  { %v1803_v28 = vpop.f32.mrb[46].mxu1 }
0x2078   :  { %1806 = vst [vmem:[#allocation14] sm:$0xff] %v1801_v40  ;;  %v1922_v44 = vpop.f32.mrb[47].mxu1 }
0x2079   :  { %2233 = shalt.err (!%p2230_p10)
}
0x207a   :  { %s2234_s10 = scalar_lea.hbm %s3174_s11, 128 }
0x207b   :  { %p2235_p11 = scmp.ne.s32.totalorder %s3174_s11, %s2234_s10  ;;  %p2238_p12 = scmp.lt.u32.totalorder %s2234_s10, %s3174_s11 }
0x207d   :  { %p2240_p13 = pnand %p2238_p12, %p2235_p11 }
0x207f   :  { %2243 = shalt.err (!%p2240_p13)
}
0x2080   :  { %1816 = dma.vmem_to_hbm [thread:$0]  %s1814_s19, 128, %s3174_s11, [#allocation5]  }
0x2081   :  { %2252 = dma.done.wait [#allocation5], 128  }
0x2082   :  { %2253 = vsyncadd [#allocation5], 4294967168 }
0x2083   :  { %1820 = vsyncpa [#allocation4], 1 }
0x2084   :  { %1821 = vsyncpa [#allocation7], 1 }
0x2085   :  { %1822 = vsyncpa [#allocation10], 1 }
0x2086   :  { %1823 = vsyncpa [#allocation13], 1 }
0x2087   :  { %1824 = vsyncpa [#allocation5], 1 }

</bundles_post_ra>
